<compile_context>
chip_gen: v5e
topology: v5e:2x2
jax: 0.10.0
libtpu: 0.0.40
codegen_flags: <defaults>
</compile_context>

<pallas_src>
import functools
import math

import jax
import jax.numpy as jnp
from jax.experimental import pallas as pl
from jax.experimental.pallas import tpu as pltpu


def _round_up(x, m):
    return (x + m - 1) // m * m


def _pick_tile_height(N, Ho, Wo, Wp, Cin, Cout_pad, k, s,
                      budget_bytes=12 << 20, cap=32):
    """Largest output-row tile height TH that (a) keeps the per-step working set
    inside a conservative VMEM budget (double-buffered IO + in-register patch),
    (b) satisfies (TH*s) % (k-s) == 0 so the halo block lands on an element
    boundary expressible as a block index, and (c) leaves >=2 grid points when
    N == 1 so both v7x TensorCores get work."""
    halo = k - s
    max_th = min(Ho, cap)
    if N == 1:
        max_th = min(max_th, max(1, (Ho + 1) // 2))
    for th in range(max_th, 0, -1):
        if halo > 0 and (th * s) % halo:
            continue
        slab_rows = th * s + halo
        est = 4 * (2 * th * s * Wp * Cin          # body block, double buffered
                   + 2 * halo * Wp * Cin          # halo block, double buffered
                   + 2 * th * Wo * Cout_pad       # output tile, double buffered
                   + slab_rows * Wp * Cin         # concatenated slab
                   + slab_rows * Wo * k * Cin     # width-shifted slab
                   + th * Wo * k * k * Cin        # im2col patch
                   + th * Wo * Cout_pad           # matmul result
                   + 2 * k * k * Cin * Cout_pad)  # weights
        if est <= budget_bytes:
            return th
    g = math.gcd(halo, s) if halo > 0 else 1
    return (halo // g) if halo > 0 else 1


def conv_prelu_tile_kernel(alpha_ref, xb_ref, xh_ref, w_ref, b_ref, o_ref,
                           *, k, s, th, wo):
    """One grid step = TH output rows x all Wo cols x all padded channels.

      alpha_ref: SMEM (1,)                     PReLU slope (scalar prefetch)
      xb_ref:    VMEM (1, TH*s, Wp, Cin)       body rows of the padded input
      xh_ref:    VMEM (1, k-s, Wp, Cin)        halo rows (start of next body)
      w_ref:     VMEM (k*k*Cin, Cout_pad)      weights, K ordered (dy, dx, cin)
      b_ref:     VMEM (1, Cout_pad)
      o_ref:     VMEM (1, TH, Wo, Cout_pad)
    """
    cin = xb_ref.shape[-1]

    body = xb_ref[0]                                   # (TH*s,  Wp, Cin)
    halo_rows = xh_ref[0]                              # (k-s,   Wp, Cin)
    slab = jnp.concatenate([body, halo_rows], axis=0)  # (TH*s+k-s, Wp, Cin)

    def wslice(a, dx):                                 # width shift / decimate
        if s == 1:
            return a[:, dx:dx + wo, :]
        # TODO(synk): for stride > 1 move the column decimation into the DMA
        # (pl.ds with stride) instead of an in-register strided sublane slice.
        return a[:, dx:dx + (wo - 1) * s + 1:s, :]

    def hslice(a, dy):                                 # row window / decimate
        if s == 1:
            return a[dy:dy + th]
        return a[dy:dy + (th - 1) * s + 1:s]

    # Width shifts once on the whole slab (k lane-concats), then k row windows:
    # final K-order is (dy, dx, cin), matching the weight reshape.
    wshift = jnp.concatenate([wslice(slab, dx) for dx in range(k)], axis=-1)
    patch = jnp.concatenate([hslice(wshift, dy) for dy in range(k)], axis=-1)
    patch2 = patch.reshape(th * wo, k * k * cin)       # (TH*Wo, k*k*Cin)

    # Single MXU pass with K = k*k*Cin, f32 accumulation.
    y = jnp.dot(patch2, w_ref[...], preferred_element_type=jnp.float32)
    y = y + b_ref[...]
    alpha = alpha_ref[0]
    y = jnp.where(y >= 0.0, y, alpha * y)
    o_ref[0] = y.reshape(th, wo, -1).astype(o_ref.dtype)


@functools.partial(jax.jit, static_argnums=(4, 5, 6))
def conv_block_forward(x_nchw, weight_oihw, bias, alpha,
                       kernel_size, stride, padding):
    """Conv2d(kernel_size, stride, padding) + PReLU.  x_nchw: (N, Cin, H, W)."""
    N, Cin, H, W = x_nchw.shape
    Cout = weight_oihw.shape[0]
    k, s, p = kernel_size, stride, padding
    if k <= s:
        # TODO(synk): halo-free path for kernel_size <= stride (not used by ABPN).
        raise NotImplementedError("conv_block_forward requires kernel_size > stride")

    Ho = (H + 2 * p - k) // s + 1
    Wo = (W + 2 * p - k) // s + 1
    Wp = W + 2 * p
    Cout_pad = _round_up(Cout, 128)          # lane-dense output tile
    halo = k - s

    TH = _pick_tile_height(N, Ho, Wo, Wp, Cin, Cout_pad, k, s)
    n_tiles = -(-Ho // TH)
    Ho_pad = n_tiles * TH
    # Padded input height: enough rows for every body block plus the last halo.
    Hp_total = max(n_tiles * TH * s + halo, H + 2 * p)
    halo_step = (TH * s) // halo             # guaranteed integral by TH choice

    # ---- glue (cheap): layout + zero padding only, no im2col in HBM ---------
    x_nhwc = jnp.transpose(x_nchw, (0, 2, 3, 1))
    x_pad = jnp.pad(x_nhwc, ((0, 0), (p, Hp_total - H - p), (p, p), (0, 0)))

    # weight (Cout, Cin, kh, kw) -> (kh, kw, Cin, Cout) -> (k*k*Cin, Cout_pad)
    # K-order (dy, dx, cin) matches the in-kernel patch construction.
    w_r = jnp.transpose(weight_oihw, (2, 3, 1, 0)).reshape(k * k * Cin, Cout)
    w_r = jnp.pad(w_r, ((0, 0), (0, Cout_pad - Cout)))
    b_row = jnp.pad(bias.reshape(1, Cout), ((0, 0), (0, Cout_pad - Cout)))
    alpha_arr = jnp.asarray(alpha, jnp.float32).reshape((1,))
    # TODO(synk): optional bf16 cast of x_pad / w_r (f32 accumulate) for v5e/v6e
    # HBM bandwidth + MXU rate; kept f32 to hold 1e-4 tolerance vs f32 reference.

    kernel = functools.partial(conv_prelu_tile_kernel, k=k, s=s, th=TH, wo=Wo)

    flops = 2 * N * Ho_pad * Wo * k * k * Cin * Cout_pad
    bytes_accessed = 4 * (N * n_tiles * TH * s * Wp * Cin      # body reads (~1x)
                          + N * n_tiles * halo * Wp * Cin      # halo re-reads
                          + k * k * Cin * Cout_pad             # weights (resident)
                          + Cout_pad                           # bias
                          + N * Ho_pad * Wo * Cout_pad)        # output

    out_pad = pl.pallas_call(
        kernel,
        out_shape=jax.ShapeDtypeStruct((N, Ho_pad, Wo, Cout_pad), jnp.float32),
        grid_spec=pltpu.PrefetchScalarGridSpec(
            num_scalar_prefetch=1,                             # alpha -> SMEM
            grid=(N, n_tiles),
            in_specs=[
                # body rows [t*TH*s, (t+1)*TH*s) of the padded input
                pl.BlockSpec((1, TH * s, Wp, Cin),
                             lambda n, t, alpha: (n, t, 0, 0)),
                # halo rows [(t+1)*TH*s, (t+1)*TH*s + k - s)
                pl.BlockSpec((1, halo, Wp, Cin),
                             lambda n, t, alpha: (n, (t + 1) * halo_step, 0, 0)),
                # small weight / bias stay resident in VMEM (constant index)
                pl.BlockSpec((k * k * Cin, Cout_pad),
                             lambda n, t, alpha: (0, 0)),
                pl.BlockSpec((1, Cout_pad),
                             lambda n, t, alpha: (0, 0)),
            ],
            out_specs=pl.BlockSpec((1, TH, Wo, Cout_pad),
                                   lambda n, t, alpha: (n, t, 0, 0)),
        ),
        compiler_params=pltpu.CompilerParams(
            dimension_semantics=("parallel", "parallel"),
            vmem_limit_bytes=32 * 1024 * 1024),
        cost_estimate=pl.CostEstimate(flops=flops, transcendentals=0,
                                      bytes_accessed=bytes_accessed),
    )(alpha_arr, x_pad, x_pad, w_r, b_row)

    # (N, Ho_pad, Wo, Cout_pad) -> drop row / channel padding -> NCHW
    out = out_pad[:, :Ho, :, :Cout]
    return jnp.transpose(out, (0, 3, 1, 2))


def reference_forward(x_nchw, weight_oihw, bias, alpha, stride, padding):
    y = jax.lax.conv_general_dilated(
        x_nchw, weight_oihw,
        window_strides=(stride, stride),
        padding=((padding, padding), (padding, padding)),
        dimension_numbers=("NCHW", "OIHW", "NCHW"),
    )
    y = y + bias.reshape(1, -1, 1, 1)
    return jnp.where(y >= 0, y, alpha * y)


if __name__ == "__main__":
    # ConvBlock(input_size=4, output_size=8, kernel_size=3, stride=1, padding=1)
    N, Cin, H, W = 2, 4, 16, 16
    Cout, k, s, p = 8, 3, 1, 1

    key = jax.random.PRNGKey(0)
    kx, kw, kb = jax.random.split(key, 3)
    x = jax.random.normal(kx, (N, Cin, H, W), dtype=jnp.float32)
    weight = jax.random.normal(kw, (Cout, Cin, k, k), dtype=jnp.float32) * 0.1
    bias = jax.random.normal(kb, (Cout,), dtype=jnp.float32) * 0.1
    alpha = jnp.float32(0.25)  # nn.PReLU() default init

    out = conv_block_forward(x, weight, bias, alpha, k, s, p)
    out = jax.block_until_ready(out)

    ref = jax.block_until_ready(reference_forward(x, weight, bias, alpha, s, p))
    assert out.shape == (N, Cout, H, W)
    assert jnp.allclose(out, ref, atol=1e-4, rtol=1e-4)

    print("KERNEL_OK")
</pallas_src>

<mosaic_0001>
module attributes {stable_mosaic.version = 11 : i64} {
  func.func @conv_prelu_tile_kernel(%arg0: i32, %arg1: i32, %arg2: memref<1xf32, #tpu.memory_space<smem>>, %arg3: memref<1x16x18x4xf32, #tpu.memory_space<vmem>>, %arg4: memref<1x2x18x4xf32, #tpu.memory_space<vmem>>, %arg5: memref<36x128xf32, #tpu.memory_space<vmem>>, %arg6: memref<1x128xf32, #tpu.memory_space<vmem>>, %arg7: memref<1x16x16x128xf32, #tpu.memory_space<vmem>>) attributes {dimension_semantics = [#tpu.dimension_semantics<parallel>, #tpu.dimension_semantics<parallel>], iteration_bounds = array<i64: 2, 1>, scalar_prefetch = 1 : i64, scratch_operands = 0 : i64, tpu.core_type = #tpu.core_type<tc>, window_params = [{transform_indices = @transform_0, window_bounds = array<i64: 1, 16, 18, 4>}, {transform_indices = @transform_1, window_bounds = array<i64: 1, 2, 18, 4>}, {pipeline_mode = #tpu.pipeline_mode<synchronous>, transform_indices = @transform_2, window_bounds = array<i64: 36, 128>}, {pipeline_mode = #tpu.pipeline_mode<synchronous>, transform_indices = @transform_3, window_bounds = array<i64: 1, 128>}, {transform_indices = @transform_4, window_bounds = array<i64: 1, 16, 16, 128>}]} {
    %c0 = arith.constant 0 : index
    %c0_0 = arith.constant 0 : index
    %c0_1 = arith.constant 0 : index
    %c0_2 = arith.constant 0 : index
    %0 = vector.load %arg3[%c0, %c0_0, %c0_1, %c0_2] : memref<1x16x18x4xf32, #tpu.memory_space<vmem>>, vector<1x16x18x4xf32>
    %1 = vector.shape_cast %0 : vector<1x16x18x4xf32> to vector<16x18x4xf32>
    %c0_3 = arith.constant 0 : index
    %c0_4 = arith.constant 0 : index
    %c0_5 = arith.constant 0 : index
    %c0_6 = arith.constant 0 : index
    %2 = vector.load %arg4[%c0_3, %c0_4, %c0_5, %c0_6] : memref<1x2x18x4xf32, #tpu.memory_space<vmem>>, vector<1x2x18x4xf32>
    %3 = vector.shape_cast %2 : vector<1x2x18x4xf32> to vector<2x18x4xf32>
    %4 = tpu.concatenate %1, %3 in 0 : vector<16x18x4xf32>, vector<2x18x4xf32> -> vector<18x18x4xf32>
    %5 = vector.extract_strided_slice %4 {offsets = [0, 0, 0], sizes = [18, 16, 4], strides = [1, 1, 1]} : vector<18x18x4xf32> to vector<18x16x4xf32>
    %6 = vector.extract_strided_slice %4 {offsets = [0, 1, 0], sizes = [18, 16, 4], strides = [1, 1, 1]} : vector<18x18x4xf32> to vector<18x16x4xf32>
    %7 = vector.extract_strided_slice %4 {offsets = [0, 2, 0], sizes = [18, 16, 4], strides = [1, 1, 1]} : vector<18x18x4xf32> to vector<18x16x4xf32>
    %8 = tpu.concatenate %5, %6, %7 in 2 : vector<18x16x4xf32>, vector<18x16x4xf32>, vector<18x16x4xf32> -> vector<18x16x12xf32>
    %9 = vector.extract_strided_slice %8 {offsets = [0, 0, 0], sizes = [16, 16, 12], strides = [1, 1, 1]} : vector<18x16x12xf32> to vector<16x16x12xf32>
    %10 = vector.extract_strided_slice %8 {offsets = [1, 0, 0], sizes = [16, 16, 12], strides = [1, 1, 1]} : vector<18x16x12xf32> to vector<16x16x12xf32>
    %11 = vector.extract_strided_slice %8 {offsets = [2, 0, 0], sizes = [16, 16, 12], strides = [1, 1, 1]} : vector<18x16x12xf32> to vector<16x16x12xf32>
    %12 = tpu.concatenate %9, %10, %11 in 2 : vector<16x16x12xf32>, vector<16x16x12xf32>, vector<16x16x12xf32> -> vector<16x16x36xf32>
    %13 = vector.shape_cast %12 : vector<16x16x36xf32> to vector<256x36xf32>
    %c0_7 = arith.constant 0 : index
    %c0_8 = arith.constant 0 : index
    %14 = vector.load %arg5[%c0_7, %c0_8] : memref<36x128xf32, #tpu.memory_space<vmem>>, vector<36x128xf32>
    %cst = arith.constant dense<0.000000e+00> : vector<256x128xf32>
    %15 = tpu.matmul %13, %14, %cst {dimension_numbers = #tpu.dot_dimension_numbers<[1], [0], [0], [1], [0, 0, 1, 1], [], []>} : vector<256x36xf32>, vector<36x128xf32>, vector<256x128xf32> -> vector<256x128xf32>
    %c0_9 = arith.constant 0 : index
    %c0_10 = arith.constant 0 : index
    %16 = vector.load %arg6[%c0_9, %c0_10] : memref<1x128xf32, #tpu.memory_space<vmem>>, vector<1x128xf32>
    %17 = vector.broadcast %16 : vector<1x128xf32> to vector<256x128xf32>
    %18 = arith.addf %15, %17 : vector<256x128xf32>
    %c0_11 = arith.constant 0 : index
    %19 = memref.load %arg2[%c0_11] : memref<1xf32, #tpu.memory_space<smem>>
    %cst_12 = arith.constant 0.000000e+00 : f32
    %20 = vector.broadcast %cst_12 : f32 to vector<256x128xf32>
    %21 = arith.cmpf oge, %18, %20 : vector<256x128xf32>
    %22 = vector.broadcast %19 : f32 to vector<256x128xf32>
    %23 = arith.mulf %22, %18 : vector<256x128xf32>
    %24 = arith.select %21, %18, %23 : vector<256x128xi1>, vector<256x128xf32>
    %25 = vector.shape_cast %24 : vector<256x128xf32> to vector<16x16x128xf32>
    %c0_13 = arith.constant 0 : index
    %c0_14 = arith.constant 0 : index
    %c0_15 = arith.constant 0 : index
    %c0_16 = arith.constant 0 : index
    %26 = vector.load %arg7[%c0_13, %c0_14, %c0_15, %c0_16] : memref<1x16x16x128xf32, #tpu.memory_space<vmem>>, vector<1x16x16x128xf32>
    %27 = vector.shape_cast %26 : vector<1x16x16x128xf32> to vector<16x16x128xf32>
    %28 = vector.shape_cast %25 : vector<16x16x128xf32> to vector<1x16x16x128xf32>
    tpu.vector_store %arg7[%c0_13, %c0_14, %c0_15, %c0_16], %28 {strides = array<i32>} : memref<1x16x16x128xf32, #tpu.memory_space<vmem>>, vector<1x16x16x128xf32>,
    return
  }
  func.func @transform_0(%arg0: i32, %arg1: i32, %arg2: memref<1xf32, #tpu.memory_space<smem>>) -> (i32, i32, i32, i32) {
    %c0_i32 = arith.constant 0 : i32
    %c0_i32_0 = arith.constant 0 : i32
    %c0_i32_1 = arith.constant 0 : i32
    return %arg0, %arg1, %c0_i32, %c0_i32_0 : i32, i32, i32, i32
  }
  func.func @transform_1(%arg0: i32, %arg1: i32, %arg2: memref<1xf32, #tpu.memory_space<smem>>) -> (i32, i32, i32, i32) {
    %c1_i32 = arith.constant 1 : i32
    %0 = arith.addi %arg1, %c1_i32 : i32
    %c8_i32 = arith.constant 8 : i32
    %1 = arith.muli %0, %c8_i32 : i32
    %c0_i32 = arith.constant 0 : i32
    %c0_i32_0 = arith.constant 0 : i32
    %c0_i32_1 = arith.constant 0 : i32
    return %arg0, %1, %c0_i32, %c0_i32_0 : i32, i32, i32, i32
  }
  func.func @transform_2(%arg0: i32, %arg1: i32, %arg2: memref<1xf32, #tpu.memory_space<smem>>) -> (i32, i32) {
    %c0_i32 = arith.constant 0 : i32
    %c0_i32_0 = arith.constant 0 : i32
    %c0_i32_1 = arith.constant 0 : i32
    return %c0_i32, %c0_i32_0 : i32, i32
  }
  func.func @transform_3(%arg0: i32, %arg1: i32, %arg2: memref<1xf32, #tpu.memory_space<smem>>) -> (i32, i32) {
    %c0_i32 = arith.constant 0 : i32
    %c0_i32_0 = arith.constant 0 : i32
    %c0_i32_1 = arith.constant 0 : i32
    return %c0_i32, %c0_i32_0 : i32, i32
  }
  func.func @transform_4(%arg0: i32, %arg1: i32, %arg2: memref<1xf32, #tpu.memory_space<smem>>) -> (i32, i32, i32, i32) {
    %c0_i32 = arith.constant 0 : i32
    %c0_i32_0 = arith.constant 0 : i32
    %c0_i32_1 = arith.constant 0 : i32
    return %arg0, %arg1, %c0_i32, %c0_i32_0 : i32, i32, i32, i32
  }
}

</mosaic_0001>

<bundles_post_ra>
// kernel: conv_block_forward.1
= control target key start
LH: loop header
LB: loop body
LE: loop exit
PB: predicated region body
PF: predicated region fallthrough
CT: control target
= control target key end

     0   :  { %s1819_s20 = smov 0   ;;  %s1821_s21 = smov 0   ;;  %s2906_s0 = inlined_call_operand.<no memory space> [shape: f32[1], index: 0, kind: input, shape index: {}]   ;;  %s2907_s1 = inlined_call_operand.vmem [shape: f32[2,18,18,4], index: 1, kind: input, shape index: {}, may-alias: {1,2}]   ;;  %s2908_s2 = inlined_call_operand.vmem [shape: f32[2,18,18,4], index: 2, kind: input, shape index: {}, may-alias: {1,2}]   ;;  %s2909_s3 = inlined_call_operand.vmem [shape: f32[36,128], index: 3, kind: input, shape index: {}]   ;;  %s2910_s4 = inlined_call_operand.vmem [shape: f32[1,128], index: 4, kind: input, shape index: {}]   ;;  %s2911_s5 = inlined_call_operand.vmem [shape: f32[2,16,16,128], index: 5, kind: output, shape index: {}]  }
   0x1   :  { %10 = sst [smem:[#allocation3]] %s2906_s0  ;;  %s1823_s22 = smov 0  }
   0x2 LB: > { %s28_s0 = sadd.s32 1, %s1776_s21  ;;  %p1668_p0 = scmp.ge.s32.totalorder %s1780_s22, 1  ;;  %s1780_s22 = sphi %s1823_s22, %s16_s22   ;;  %s1776_s21 = sphi %s1821_s21, %s2977_s21   ;;  %s1772_s20 = sphi %s1819_s20, %s2976_s20  }
   0x3   : > { %p30_p1 = scmp.ge.s32.totalorder %s28_s0, 2  ;;  %p222_p2 = scmp.lt.s32.totalorder %s1780_s22, 3 }
   0x5   : > { %s2979_s0 = smov (%p30_p1, %s28_s0), 0  ;;  %p223_p3 = pnand %p1668_p0, %p222_p2 }
   0x7   : > { %226 = sbr.rel (%p223_p3) target bundleno = 692 (0x2b4), region = 36 }
   0xc   : > { %p281_p4 = scmp.lt.s32.totalorder %s1772_s20, 1  ;;  %vm430_vm0 = vcmask 1046528   ;;  %s1782_s27 = smov 4   ;;  %vm629_vm1 = vcmask 1045504   ;;  %vm828_vm2 = vcmask 31744   ;;  %vm865_vm3 = vcmask 64512  }
   0xd   : > { %s1783_s7 = smov 8   ;;  %s1784_s8 = smov 12   ;;  %vm1300_vm4 = vcmask 1043456   ;;  %vm1128_vm5 = vcmask 97280   ;;  %vm1161_vm6 = vcmask 195584   ;;  %vm1203_vm7 = vcmask 293888  }
   0xe   : > { %s2981_s20 = smov (!%p281_p4, %s1772_s20), 1  ;;  %s1785_s9 = smov 24  }
   0xf   : > { %s1726_s23 = smul.u32 432, %s2981_s20 }
  0x11   : > { %s1845_s26 = scalar_lea.vmem %s2907_s1, %s1726_s23  ;;  %s1709_s28 = sadd.s32 384, %s1726_s23 }
  0x12   : > { %v1848_v0 = vld [vmem:[%s1845_s26 + $0x30] sm:$0xff]  ;;  %v1851_v1 = vld [vmem:[%s1845_s26 + $0x38] sm:$0xff]  ;;  %v1859_v5 = vld [vmem:[%s1845_s26 + $0x20] sm:$0xff]  ;;  %s307_s6 = scalar_lea.vmem %s2908_s2, %s1709_s28  ;;  %s1417_s23 = sld [smem:[#allocation3]] }
  0x13   : > { %2926 = vst [vmem:[#allocation4_spill] sm:$0xff] %v1851_v1  ;;  %v1854_v2 = vld [vmem:[%s1845_s26 + $0x18] sm:$0xff]  ;;  %v441_v3 = vrot.slane %v1848_v0, 1  ;;  %v442_v4 = vrot.slane %v1851_v1, 1  ;;  %v1863_v7 = vld [vmem:[%s1845_s26] sm:$0xff]  ;;  %v1866_v8 = vld [vmem:[%s1845_s26 + $0x8] sm:$0xff] }
  0x14   : > { %2927 = vst [vmem:[#allocation5_spill] sm:$0xff] %v1859_v5  ;;  %v436_v6 = vrot.slane %v1854_v2, 1  ;;  %v437_v9 = vrot.slane %v1859_v5, 1  ;;  %v431_v10 = vrot.slane %v1863_v7, 1  ;;  %v432_v11 = vrot.slane %v1866_v8, 1  ;;  %v1893_v24 = vld [vmem:[%s1845_s26 + $0x60] sm:$0xff] }
  0x15   : > { %v1872_v12 = vld [vmem:[%s1845_s26 + $0x40] sm:$0x3]  ;;  %v443_v13 = vsel %vm430_vm0, %v441_v3, %v442_v4  ;;  %v1876_v14 = vld [vmem:[%s1845_s26 + $0x28] sm:$0x3]  ;;  %v1879_v15 = vld [vmem:[%s1845_s26 + $0x10] sm:$0x3] }
  0x16   : > { %529 = vrot.lane.b32.xlu2 %v443_v13, %s1782_s27  ;;  %v438_v16 = vsel %vm430_vm0, %v436_v6, %v437_v9  ;;  %v433_v17 = vsel %vm430_vm0, %v431_v10, %v432_v11  ;;  %v444_v18 = vrot.slane %v1872_v12, 1  ;;  %v439_v19 = vrot.slane %v1876_v14, 1  ;;  %v1896_v25 = vld [vmem:[%s1845_s26 + $0x68] sm:$0xff]  ;;  %v1899_v26 = vld [vmem:[%s1845_s26 + $0x50] sm:$0xff]  ;;  %v1902_v27 = vld [vmem:[%s1845_s26 + $0x58] sm:$0x3] }
  0x17   : > { %525 = vrot.lane.b32.xlu1 %v438_v16, %s1782_s27  ;;  %521 = vrot.lane.b32.xlu0 %v433_v17, %s1782_s27  ;;  %v434_v20 = vrot.slane %v1879_v15, 1  ;;  %v1905_v28 = vld [vmem:[%s1845_s26 + $0x48] sm:$0xff]  ;;  %v451_v29 = vrot.slane %v1893_v24, 1  ;;  %v452_v30 = vrot.slane %v1896_v25, 1  ;;  %v447_v31 = vrot.slane %v1899_v26, 1  ;;  %v1919_v37 = vld [vmem:[%s1845_s26 + $0x80] sm:$0xff] }
  0x18   : > { %v445_v21 = vsel %vm430_vm0, %v442_v4, %v444_v18  ;;  %v440_v22 = vsel %vm430_vm0, %v437_v9, %v439_v19  ;;  %v449_v32 = vrot.slane %v1902_v27, 1  ;;  %v446_v33 = vrot.slane %v1905_v28, 1  ;;  %2928 = vst [vmem:[#allocation6_spill] sm:$0xff] %v1919_v37  ;;  %v1922_v38 = vld [vmem:[%s1845_s26 + $0x88] sm:$0x3]  ;;  %v1925_v39 = vld [vmem:[%s1845_s26 + $0x78] sm:$0xff] }
  0x19   : > { %v435_v23 = vsel %vm430_vm0, %v432_v11, %v434_v20  ;;  %v453_v34 = vsel %vm430_vm0, %v451_v29, %v452_v30  ;;  %v1928_v40 = vld [vmem:[%s1845_s26 + $0x70] sm:$0x3]  ;;  %v457_v41 = vrot.slane %v1919_v37, 1  ;;  %v459_v42 = vrot.slane %v1922_v38, 1  ;;  %v1941_v48 = vld [vmem:[%s1845_s26 + $0xa8] sm:$0xff]  ;;  %v1947_v50 = vld [vmem:[%s1845_s26 + $0x98] sm:$0xff] }
  0x1a   : > { %v450_v35 = vsel %vm430_vm0, %v447_v31, %v449_v32  ;;  %v448_v36 = vsel %vm430_vm0, %v446_v33, %v447_v31  ;;  %v456_v43 = vrot.slane %v1925_v39, 1  ;;  %v454_v44 = vrot.slane %v1928_v40, 1  ;;  %v1944_v49 = vld [vmem:[%s1845_s26 + $0xb0] sm:$0xff]  ;;  %2929 = vst [vmem:[#allocation7_spill] sm:$0xff] %v1947_v50  ;;  %v1950_v51 = vld [vmem:[%s1845_s26 + $0xa0] sm:$0x3] }
  0x1b   : > { %v460_v45 = vsel %vm430_vm0, %v457_v41, %v459_v42  ;;  %v1953_v52 = vld [vmem:[%s1845_s26 + $0x90] sm:$0xff]  ;;  %v466_v53 = vrot.slane %v1941_v48, 1  ;;  %v467_v54 = vrot.slane %v1944_v49, 1  ;;  %v462_v55 = vrot.slane %v1947_v50, 1  ;;  %v1967_v61 = vld [vmem:[%s1845_s26 + $0xc8] sm:$0xff]  ;;  %v1973_v63 = vld [vmem:[%s1845_s26 + $0xc0] sm:$0xff] }
  0x1c   : > { %v458_v46 = vsel %vm430_vm0, %v456_v43, %v457_v41  ;;  %v455_v47 = vsel %vm430_vm0, %v452_v30, %v454_v44  ;;  %v464_v56 = vrot.slane %v1950_v51, 1  ;;  %v461_v57 = vrot.slane %v1953_v52, 1  ;;  %v1970_v62 = vld [vmem:[%s1845_s26 + $0xd0] sm:$0x3]  ;;  %2931 = vst [vmem:[#allocation9_spill] sm:$0xff] %v1973_v63  ;;  %v1986_v11 = vld [vmem:[%s1845_s26 + $0x140] sm:$0xff] }
  0x1d   : > { %v468_v58 = vsel %vm430_vm0, %v466_v53, %v467_v54  ;;  %2930 = vst [vmem:[#allocation8_spill] sm:$0xff] %v1970_v62  ;;  %v1976_v3 = vld [vmem:[%s1845_s26 + $0xb8] sm:$0x3]  ;;  %v472_v4 = vrot.slane %v1967_v61, 1  ;;  %v474_v6 = vrot.slane %v1970_v62, 1  ;;  %v471_v9 = vrot.slane %v1973_v63, 1 }
  0x1e   : > { %531 = vrot.lane.b32.xlu2 %v445_v21, %s1782_s27  ;;  %v465_v59 = vsel %vm430_vm0, %v462_v55, %v464_v56  ;;  %v463_v60 = vsel %vm430_vm0, %v461_v57, %v462_v55  ;;  %v469_v10 = vrot.slane %v1976_v3, 1  ;;  %v1990_v16 = vld [vmem:[%s1845_s26 + $0x148] sm:$0x3]  ;;  %v1995_v19 = vld [vmem:[%s1845_s26 + $0xf0] sm:$0xff]  ;;  %v1998_v20 = vld [vmem:[%s1845_s26 + $0xf8] sm:$0xff]  ;;  %v497_v21 = vrot.slane %v1986_v11, 1 }
  0x1f   : > { %527 = vrot.lane.b32.xlu1 %v440_v22, %s1782_s27  ;;  %523 = vrot.lane.b32.xlu0 %v435_v23, %s1782_s27  ;;  %v475_v13 = vsel %vm430_vm0, %v472_v4, %v474_v6  ;;  %v473_v17 = vsel %vm430_vm0, %v471_v9, %v472_v4  ;;  %2932 = vst [vmem:[#allocation10_spill] sm:$0xff] %v1998_v20  ;;  %v499_v22 = vrot.slane %v1990_v16, 1  ;;  %v2003_v23 = vld [vmem:[%s1845_s26 + $0xe0] sm:$0xff]  ;;  %v2006_v29 = vld [vmem:[%s1845_s26 + $0xe8] sm:$0x3]  ;;  %v481_v32 = vrot.slane %v1995_v19, 1 }
  0x20   : > { %v470_v18 = vsel %vm430_vm0, %v467_v54, %v469_v10  ;;  %v2009_v30 = vld [vmem:[%s1845_s26 + $0xd8] sm:$0xff]  ;;  %v482_v33 = vrot.slane %v1998_v20, 1  ;;  %v2024_v44 = vld [vmem:[%s1845_s26 + $0x110] sm:$0xff]  ;;  %v2049_v4 = vld [vmem:[%s1845_s26 + $0x128] sm:$0xff] }
  0x21   : > { %v500_v31 = vsel %vm430_vm0, %v497_v21, %v499_v22  ;;  %v487_v53 = vrot.slane %v2024_v44, 1  ;;  %2933 = vst [vmem:[#allocation11_spill] sm:$0xff] %v2049_v4  ;;  %v2052_v6 = vld [vmem:[%s1845_s26 + $0x130] sm:$0x3]  ;;  %v2055_v9 = vld [vmem:[%s1845_s26 + $0x120] sm:$0xff] }
  0x22   : > { %v483_v41 = vsel %vm430_vm0, %v481_v32, %v482_v33 }
  0x26   : > { %537 = vrot.lane.b32.xlu2 %v453_v34, %s1782_s27  ;;  %v477_v34 = vrot.slane %v2003_v23, 1 }
  0x27   : > { %535 = vrot.lane.b32.xlu1 %v450_v35, %s1782_s27  ;;  %533 = vrot.lane.b32.xlu0 %v448_v36, %s1782_s27  ;;  %v479_v35 = vrot.slane %v2006_v29, 1  ;;  %v476_v36 = vrot.slane %v2009_v30, 1 }
  0x29   : > { %v480_v42 = vsel %vm430_vm0, %v477_v34, %v479_v35  ;;  %v478_v43 = vsel %vm430_vm0, %v476_v36, %v477_v34  ;;  %v2068_v34 = vld [vmem:[%s1845_s26 + $0x158] sm:$0xff]  ;;  %v2071_v35 = vld [vmem:[%s1845_s26 + $0x160] sm:$0x3]  ;;  %v2074_v36 = vld [vmem:[%s1845_s26 + $0x150] sm:$0xff] }
  0x2a   : > { %2934 = vst [vmem:[#allocation12_spill] sm:$0xff] %v2068_v34 }
  0x2e   : > { %543 = vrot.lane.b32.xlu2 %v460_v45, %s1782_s27  ;;  %v2027_v45 = vld [vmem:[%s1845_s26 + $0x118] sm:$0x3] }
  0x2f   : > { %541 = vrot.lane.b32.xlu1 %v458_v46, %s1782_s27  ;;  %539 = vrot.lane.b32.xlu0 %v455_v47, %s1782_s27  ;;  %v2030_v46 = vld [vmem:[%s1845_s26 + $0x108] sm:$0xff]  ;;  %v2033_v47 = vld [vmem:[%s1845_s26 + $0x100] sm:$0x3]  ;;  %v489_v54 = vrot.slane %v2027_v45, 1 }
  0x30   : > { %v486_v55 = vrot.slane %v2030_v46, 1  ;;  %v484_v56 = vrot.slane %v2033_v47, 1 }
  0x31   : > { %v490_v57 = vsel %vm430_vm0, %v487_v53, %v489_v54  ;;  %v2089_v54 = vld [vmem:[%s307_s6] sm:$0xff] }
  0x32   : > { %2935 = vst [vmem:[#allocation13_spill] sm:$0xff] %v2089_v54 }
  0x36   : > { %549 = vrot.lane.b32.xlu2 %v468_v58, %s1782_s27  ;;  %v488_v58 = vsel %vm430_vm0, %v486_v55, %v487_v53  ;;  %v2091_v55 = vld [vmem:[%s307_s6 + $0x8] sm:$0xff] }
  0x37   : > { %547 = vrot.lane.b32.xlu1 %v465_v59, %s1782_s27  ;;  %545 = vrot.lane.b32.xlu0 %v463_v60, %s1782_s27  ;;  %v485_v59 = vsel %vm430_vm0, %v482_v33, %v484_v56  ;;  %v2046_v60 = vld [vmem:[%s1845_s26 + $0x138] sm:$0xff]  ;;  %2936 = vst [vmem:[#allocation14_spill] sm:$0xff] %v2091_v55  ;;  %v2094_v56 = vld [vmem:[%s1845_s26 + $0x170] sm:$0xff] }
  0x38   : > { %v496_v10 = vrot.slane %v2046_v60, 1 }
  0x3a   : > { %v498_v22 = vsel %vm430_vm0, %v496_v10, %v497_v21  ;;  %v502_v21 = vrot.slane %v2068_v34, 1  ;;  %v512_v10 = vrot.slane %v2091_v55, 1 }
  0x3e   : > { %555 = vrot.lane.b32.xlu2 %v475_v13, %s1782_s27  ;;  %v492_v13 = vrot.slane %v2049_v4, 1 }
  0x3f   : > { %553 = vrot.lane.b32.xlu1 %v473_v17, %s1782_s27  ;;  %551 = vrot.lane.b32.xlu0 %v470_v18, %s1782_s27  ;;  %v494_v17 = vrot.slane %v2052_v6, 1  ;;  %v491_v18 = vrot.slane %v2055_v9, 1 }
  0x41   : > { %v495_v32 = vsel %vm430_vm0, %v492_v13, %v494_v17  ;;  %v493_v33 = vsel %vm430_vm0, %v491_v18, %v492_v13  ;;  %v507_v13 = vrot.slane %v2094_v56, 1 }
  0x46   : > { %561 = vrot.lane.b32.xlu2 %v483_v41, %s1782_s27  ;;  %v504_v41 = vrot.slane %v2071_v35, 1 }
  0x47   : > { %559 = vrot.lane.b32.xlu1 %v480_v42, %s1782_s27  ;;  %557 = vrot.lane.b32.xlu0 %v478_v43, %s1782_s27  ;;  %v501_v42 = vrot.slane %v2074_v36, 1 }
  0x48   : > { %v505_v43 = vsel %vm430_vm0, %v502_v21, %v504_v41  ;;  %v2115_v41 = vld [vmem:[%s307_s6 + $0x28] sm:$0x3] }
  0x49   : > { %v503_v53 = vsel %vm430_vm0, %v501_v42, %v502_v21  ;;  %v2113_v21 = vld [vmem:[%s307_s6 + $0x20] sm:$0xff]  ;;  %2937 = vst [vmem:[#allocation15_spill] sm:$0xff] %v2115_v41  ;;  %v2119_v42 = vld [vmem:[%s307_s6 + $0x10] sm:$0x3] }
  0x4e   : > { %567 = vrot.lane.b32.xlu2 %v490_v57, %s1782_s27  ;;  %v2097_v57 = vld [vmem:[%s1845_s26 + $0x178] sm:$0x3] }
  0x4f   : > { %565 = vrot.lane.b32.xlu1 %v488_v58, %s1782_s27  ;;  %563 = vrot.lane.b32.xlu0 %v485_v59, %s1782_s27  ;;  %v2100_v58 = vld [vmem:[%s1845_s26 + $0x168] sm:$0xff]  ;;  %v511_v59 = vrot.slane %v2089_v54, 1  ;;  %v509_v17 = vrot.slane %v2097_v57, 1  ;;  %s1710_s26 = sshll.u32 %s2981_s20, 8 }
  0x50   : > { %v506_v18 = vrot.slane %v2100_v58, 1  ;;  %s2762_s29 = scalar_lea.vmem %s2911_s5, %s1710_s26 }
  0x56   : > { %573 = vrot.lane.b32.xlu2 %v498_v22, %s1782_s27  ;;  %v513_v22 = vsel %vm430_vm0, %v511_v59, %v512_v10 }
  0x57   : > { %571 = vrot.lane.b32.xlu1 %v495_v32, %s1782_s27  ;;  %569 = vrot.lane.b32.xlu0 %v493_v33, %s1782_s27  ;;  %v510_v32 = vsel %vm430_vm0, %v507_v13, %v509_v17  ;;  %v508_v33 = vsel %vm430_vm0, %v506_v18, %v507_v13  ;;  %v514_v13 = vrot.slane %v2119_v42, 1 }
  0x59   : > { %v515_v62 = vsel %vm430_vm0, %v512_v10, %v514_v13 }
  0x5e   : > { %579 = vrot.lane.b32.xlu2 %v505_v43, %s1782_s27  ;;  %v517_v43 = vrot.slane %v2113_v21, 1 }
  0x5f   : > { %577 = vrot.lane.b32.xlu1 %v503_v53, %s1782_s27  ;;  %575 = vrot.lane.b32.xlu0 %v500_v31, %s1782_s27  ;;  %v2117_v31 = vld [vmem:[%s307_s6 + $0x18] sm:$0xff]  ;;  %v519_v53 = vrot.slane %v2115_v41, 1  ;;  %v631_v41 = vrot.slane %v1866_v8, 2 }
  0x60   : > { %v516_v59 = vrot.slane %v2117_v31, 1 }
  0x61   : > { %v520_v17 = vsel %vm430_vm0, %v517_v43, %v519_v53  ;;  %v633_v53 = vrot.slane %v1879_v15, 2 }
  0x62   : > { %v518_v18 = vsel %vm430_vm0, %v516_v59, %v517_v43  ;;  %v630_v43 = vrot.slane %v1863_v7, 2 }
  0x63   : > { %v634_v59 = vsel %vm629_vm1, %v631_v41, %v633_v53 }
  0x64   : > { %v632_v13 = vsel %vm629_vm1, %v630_v43, %v631_v41 }
  0x66   : > { %585 = vrot.lane.b32.xlu2 %v513_v22, %s1782_s27  ;;  %v635_v22 = vrot.slane %v1854_v2, 2 }
  0x67   : > { %583 = vrot.lane.b32.xlu1 %v510_v32, %s1782_s27  ;;  %581 = vrot.lane.b32.xlu0 %v508_v33, %s1782_s27  ;;  %v636_v32 = vrot.slane %v1859_v5, 2 }
  0x69   : > { %v637_v10 = vsel %vm629_vm1, %v635_v22, %v636_v32  ;;  %v638_v22 = vrot.slane %v1876_v14, 2  ;;  %v646_v14 = vrot.slane %v1899_v26, 2 }
  0x6b   : > { %v639_v43 = vsel %vm629_vm1, %v636_v32, %v638_v22  ;;  %v680_v22 = vrot.slane %v1995_v19, 2 }
  0x6e   : > { %591 = vrot.lane.b32.xlu2 %v520_v17, %s1782_s27  ;;  %v643_v17 = vrot.slane %v1872_v12, 2  ;;  %v650_v12 = vrot.slane %v1893_v24, 2 }
  0x6f   : > { %589 = vrot.lane.b32.xlu1 %v518_v18, %s1782_s27  ;;  %587 = vrot.lane.b32.xlu0 %v515_v62, %s1782_s27  ;;  %v641_v62 = vrot.slane %v1851_v1, 2  ;;  %v640_v18 = vrot.slane %v1848_v0, 2 }
  0x70   : > { %v2136_v33 = vpop.permute.xlu2 %529 }
  0x71   : > { %v644_v53 = vsel %vm629_vm1, %v641_v62, %v643_v17  ;;  %v642_v41 = vsel %vm629_vm1, %v640_v18, %v641_v62  ;;  %v645_v62 = vrot.slane %v1905_v28, 2 }
  0x73   : > { %v647_v18 = vsel %vm629_vm1, %v645_v62, %v646_v14 }
  0x76   : > { %724 = vrot.lane.b32.xlu2 %v637_v10, %s1783_s7  ;;  %v2914_v10 = vrot.slane %v1896_v25, 2 }
  0x77   : > { %722 = vrot.lane.b32.xlu1 %v634_v59, %s1783_s7  ;;  %720 = vrot.lane.b32.xlu0 %v632_v13, %s1783_s7  ;;  %v648_v13 = vrot.slane %v1902_v27, 2  ;;  %v681_v27 = vrot.slane %v1998_v20, 2  ;;  %v678_v20 = vrot.slane %v2006_v29, 2  ;;  %v658_v29 = vrot.slane %v1922_v38, 2 }
  0x78   : > { %v2149_v15 = vpop.permute.xlu2 %531  ;;  %v652_v32 = vsel %vm629_vm1, %v650_v12, %v2914_v10  ;;  %v675_v12 = vrot.slane %v2009_v30, 2  ;;  %v660_v10 = vrot.slane %v1953_v52, 2  ;;  %v665_v38 = vrot.slane %v1941_v48, 2 }
  0x79   : > { %2938 = vst [vmem:[#allocation16_spill] sm:$0xff] %v2149_v15  ;;  %v649_v17 = vsel %vm629_vm1, %v646_v14, %v648_v13  ;;  %v676_v14 = vrot.slane %v2003_v23, 2  ;;  %v655_v15 = vrot.slane %v1925_v39, 2 }
  0x7e   : > { %730 = vrot.lane.b32.xlu2 %v644_v53, %s1783_s7 }
  0x7f   : > { %728 = vrot.lane.b32.xlu1 %v642_v41, %s1783_s7  ;;  %726 = vrot.lane.b32.xlu0 %v639_v43, %s1783_s7  ;;  %v695_v41 = vrot.slane %v2046_v60, 2  ;;  %v696_v43 = vrot.slane %v1986_v11, 2 }
  0x80   : > { %v2161_v59 = vpop.permute.xlu2 %537 }
  0x86   : > { %736 = vrot.lane.b32.xlu2 %v652_v32, %s1783_s7  ;;  %v682_v32 = vsel %vm629_vm1, %v680_v22, %v681_v27  ;;  %v656_v22 = vrot.slane %v1919_v37, 2 }
  0x87   : > { %734 = vrot.lane.b32.xlu1 %v649_v17, %s1783_s7  ;;  %732 = vrot.lane.b32.xlu0 %v647_v18, %s1783_s7  ;;  %v697_v17 = vsel %vm629_vm1, %v695_v41, %v696_v43  ;;  %v677_v18 = vsel %vm629_vm1, %v675_v12, %v676_v14  ;;  %v700_v41 = vrot.slane %v2074_v36, 2  ;;  %v701_v12 = vrot.slane %v2068_v34, 2 }
  0x88   : > { %v2176_v53 = vpop.permute.xlu2 %543 }
  0x89   : > { %2939 = vst [vmem:[#allocation17_spill] sm:$0xff] %v2176_v53  ;;  %v2182_v13 = vpop.permute.xlu1 %525  ;;  %v2184_v62 = vpop.permute.xlu0 %521  ;;  %v661_v53 = vrot.slane %v1947_v50, 2  ;;  %v702_v50 = vsel %vm629_vm1, %v700_v41, %v701_v12 }
  0x8e   : > { %760 = vrot.lane.b32.xlu2 %v682_v32, %s1783_s7 }
  0x8f   : > { %772 = vrot.lane.b32.xlu1 %v697_v17, %s1783_s7  ;;  %756 = vrot.lane.b32.xlu0 %v677_v18, %s1783_s7  ;;  %v662_v17 = vsel %vm629_vm1, %v660_v10, %v661_v53  ;;  %v657_v18 = vsel %vm629_vm1, %v655_v15, %v656_v22 }
  0x90   : > { %v2194_v1 = vpop.permute.xlu2 %549 }
  0x91   : > { %2940 = vst [vmem:[#allocation18_spill] sm:$0xff] %v2194_v1  ;;  %v2200_v5 = vpop.permute.xlu1 %527  ;;  %v2202_v32 = vpop.permute.xlu0 %523  ;;  %v683_v1 = vrot.slane %v2033_v47, 2  ;;  %v703_v47 = vrot.slane %v2071_v35, 2 }
  0x92   : > { %2941 = vst [vmem:[#allocation19_spill] sm:$0xff] %v2200_v5  ;;  %v698_v5 = vrot.slane %v1990_v16, 2 }
  0x93   : > { %v684_v15 = vsel %vm629_vm1, %v681_v27, %v683_v1  ;;  %v704_v27 = vsel %vm629_vm1, %v701_v12, %v703_v47 }
  0x94   : > { %v699_v41 = vsel %vm629_vm1, %v696_v43, %v698_v5  ;;  %v705_v43 = vrot.slane %v2100_v58, 2 }
  0x96   : > { %744 = vrot.lane.b32.xlu2 %v662_v17, %s1783_s7  ;;  %v679_v17 = vsel %vm629_vm1, %v676_v14, %v678_v20  ;;  %v659_v20 = vsel %vm629_vm1, %v656_v22, %v658_v29  ;;  %v685_v14 = vrot.slane %v2030_v46, 2  ;;  %v686_v22 = vrot.slane %v2024_v44, 2 }
  0x97   : > { %740 = vrot.lane.b32.xlu1 %v657_v18, %s1783_s7  ;;  %776 = vrot.lane.b32.xlu0 %v702_v50, %s1783_s7  ;;  %v663_v50 = vrot.slane %v1950_v51, 2  ;;  %v666_v51 = vrot.slane %v1944_v49, 2  ;;  %v668_v29 = vrot.slane %v1976_v3, 2  ;;  %v670_v3 = vrot.slane %v1973_v63, 2 }
  0x98   : > { %v2211_v37 = vpop.permute.xlu2 %555  ;;  %v829_v63 = vsel %vm828_vm2, %v1863_v7, %v2184_v62 }
  0x99   : > { %2942 = vst [vmem:[#allocation20_spill] sm:$0xff] %v2211_v37  ;;  %v2215_v34 = vpop.permute.xlu1 %535  ;;  %v2217_v10 = vpop.permute.xlu0 %533  ;;  %v664_v5 = vsel %vm629_vm1, %v661_v53, %v663_v50  ;;  %v706_v53 = vrot.slane %v2094_v56, 2  ;;  %v687_v50 = vsel %vm629_vm1, %v685_v14, %v686_v22 }
  0x9a   : > { %v835_v7 = vsel %vm828_vm2, %v1905_v28, %v2217_v10 }
  0x9e   : > { %762 = vrot.lane.b32.xlu2 %v684_v15, %s1783_s7 }
  0x9f   : > { %774 = vrot.lane.b32.xlu1 %v699_v41, %s1783_s7  ;;  %758 = vrot.lane.b32.xlu0 %v679_v17, %s1783_s7  ;;  %v667_v41 = vsel %vm629_vm1, %v665_v38, %v666_v51  ;;  %v707_v17 = vsel %vm629_vm1, %v705_v43, %v706_v53  ;;  %v669_v43 = vsel %vm629_vm1, %v666_v51, %v668_v29  ;;  %v711_v51 = vrot.slane %v2091_v55, 2 }
  0xa0   : > { %v2226_v16 = vpop.permute.xlu2 %561 }
  0xa1   : > { %v2230_v18 = vpop.permute.xlu1 %541  ;;  %v2232_v1 = vpop.permute.xlu0 %539 }
  0xa2   : > { %2943 = vst [vmem:[#allocation21_spill] sm:$0xff] %v2232_v1 }
  0xa6   : > { %746 = vrot.lane.b32.xlu2 %v664_v5, %s1783_s7  ;;  %v708_v5 = vrot.slane %v2097_v57, 2 }
  0xa7   : > { %742 = vrot.lane.b32.xlu1 %v659_v20, %s1783_s7  ;;  %778 = vrot.lane.b32.xlu0 %v704_v27, %s1783_s7  ;;  %v688_v20 = vrot.slane %v2027_v45, 2  ;;  %v2921_v45 = vrot.slane %v1967_v61, 2 }
  0xa8   : > { %v2242_v35 = vpop.permute.xlu2 %567  ;;  %v709_v14 = vsel %vm629_vm1, %v706_v53, %v708_v5  ;;  %v690_v53 = vrot.slane %v2055_v9, 2 }
  0xa9   : > { %v2248_v12 = vpop.permute.xlu1 %547  ;;  %v2250_v15 = vpop.permute.xlu0 %545  ;;  %v672_v5 = vsel %vm629_vm1, %v670_v3, %v2921_v45 }
  0xae   : > { %748 = vrot.lane.b32.xlu2 %v667_v41, %s1783_s7  ;;  %v689_v41 = vsel %vm629_vm1, %v686_v22, %v688_v20  ;;  %v691_v22 = vrot.slane %v2049_v4, 2 }
  0xaf   : > { %780 = vrot.lane.b32.xlu1 %v707_v17, %s1783_s7  ;;  %764 = vrot.lane.b32.xlu0 %v687_v50, %s1783_s7  ;;  %v710_v17 = vrot.slane %v2089_v54, 2 }
  0xb0   : > { %v2259_v47 = vpop.permute.xlu2 %573 }
  0xb1   : > { %v2263_v27 = vpop.permute.xlu1 %553  ;;  %v2265_v38 = vpop.permute.xlu0 %551  ;;  %v712_v20 = vsel %vm629_vm1, %v710_v17, %v711_v51 }
  0xb2   : > { %2944 = vst [vmem:[#allocation22_spill] sm:$0xff] %v2263_v27  ;;  %v830_v27 = vsel %vm828_vm2, %v1866_v8, %v2202_v32 }
  0xb6   : > { %750 = vrot.lane.b32.xlu2 %v669_v43, %s1783_s7  ;;  %v692_v43 = vsel %vm629_vm1, %v690_v53, %v691_v22 }
  0xb7   : > { %782 = vrot.lane.b32.xlu1 %v709_v14, %s1783_s7  ;;  %766 = vrot.lane.b32.xlu0 %v689_v41, %s1783_s7  ;;  %v693_v14 = vrot.slane %v2052_v6, 2 }
  0xb8   : > { %v2275_v57 = vpop.permute.xlu2 %579 }
  0xb9   : > { %v2281_v50 = vpop.permute.xlu1 %559  ;;  %v558_v29 = vpop.permute.xlu0 %557  ;;  %v694_v3 = vsel %vm629_vm1, %v691_v22, %v693_v14  ;;  %v837_v22 = vsel %vm828_vm2, %v1893_v24, %v2161_v59 }
  0xbe   : > { %752 = vrot.lane.b32.xlu2 %v672_v5, %s1783_s7 }
  0xbf   : > { %784 = vrot.lane.b32.xlu1 %v712_v20, %s1783_s7  ;;  %768 = vrot.lane.b32.xlu0 %v692_v43, %s1783_s7 }
  0xc0   : > { %v2292_v41 = vpop.permute.xlu2 %585 }
  0xc1   : > { %2945 = vst [vmem:[#allocation23_spill] sm:$0xff] %v2292_v41  ;;  %v2294_v37 = vpop.permute.xlu1 %565  ;;  %v2296_v1 = vpop.permute.xlu0 %563 }
  0xc6   : > { %770 = vrot.lane.b32.xlu2 %v694_v3, %s1783_s7 }
  0xc8   : > { %v2300_v17 = vpop.permute.xlu2 %591 }
  0xc9   : > { %2946 = vst [vmem:[#allocation24_spill] sm:$0xff] %v2300_v17  ;;  %v2302_v53 = vpop.permute.xlu1 %571  ;;  %v2304_v5 = vpop.permute.xlu0 %569 }
  0xca   : > { %2947 = vst [vmem:[#allocation25_spill] sm:$0xff] %v2302_v53 }
  0xd0   : > { %v725_v20 = vpop.permute.xlu2 %724 }
  0xd1   : > { %v578_v43 = vpop.permute.xlu1 %577  ;;  %v2306_v45 = vpop.permute.xlu0 %575 }
  0xd8   : > { %v2308_v6 = vpop.permute.xlu2 %730 }
  0xd9   : > { %v2310_v55 = vpop.permute.xlu1 %583  ;;  %v2312_v4 = vpop.permute.xlu0 %581 }
  0xe0   : > { %v737_v14 = vpop.permute.xlu2 %736 }
  0xe1   : > { %v2317_v3 = vpop.permute.xlu1 %589  ;;  %v2319_v17 = vpop.permute.xlu0 %587  ;;  %v2322_v53 = vsel %vm865_vm3, %v837_v22, %v737_v14  ;;  %v836_v22 = vsel %vm828_vm2, %v1899_v26, %v2215_v34 }
  0xe2   : > { %2948 = vst [vmem:[#allocation26_spill] sm:$0xff] %v2317_v3 }
  0xe3   : > { %2949 = vst [vmem:[#allocation27_spill] sm:$0xff] %v2319_v17 }
  0xe8   : > { %v761_v10 = vpop.permute.xlu2 %760 }
  0xe9   : > { %v723_v54 = vpop.permute.xlu1 %722  ;;  %v721_v41 = vpop.permute.xlu0 %720 }
  0xea   : > { %v2331_v24 = vsel %vm865_vm3, %v830_v27, %v723_v54  ;;  %v2334_v59 = vsel %vm865_vm3, %v829_v63, %v721_v41  ;;  %v855_v63 = vsel %vm828_vm2, %v2046_v60, %v2259_v47  ;;  %v847_v27 = vsel %vm828_vm2, %v2009_v30, %v558_v29 }
  0xeb   : > { %v713_v60 = vrot.slane %v2119_v42, 2  ;;  %v849_v47 = vsel %vm828_vm2, %v1995_v19, %v2226_v16  ;;  %v857_v29 = vsel %vm828_vm2, %v2074_v36, %v578_v43  ;;  %v653_v19 = vrot.slane %v1928_v40, 2 }
  0xec   : > { %v831_v36 = vsel %vm828_vm2, %v1854_v2, %v2182_v13  ;;  %v839_v16 = vsel %vm828_vm2, %v1925_v39, %v2230_v18  ;;  %v2951_v2 = vld [vmem:[#allocation8_spill] sm:$0xff]  ;;  %v2952_v13 = vrot.slane %v1967_v61, 2 }
  0xed   : > { %v714_v30 = vsel %vm629_vm1, %v711_v51, %v713_v60  ;;  %v2950_v51 = vrot.slane %v1896_v25, 2  ;;  %v673_v39 = vrot.slane %v2951_v2, 2  ;;  %v2958_v2 = vld [vmem:[#allocation4_spill] sm:$0xff] }
  0xef   : > { %v654_v43 = vsel %vm629_vm1, %v2950_v51, %v653_v19  ;;  %v674_v18 = vsel %vm629_vm1, %v2952_v13, %v673_v39  ;;  %v2956_v19 = vld [vmem:[#allocation5_spill] sm:$0xff]  ;;  %v2960_v13 = vld [vmem:[#allocation6_spill] sm:$0xff] }
  0xf0   : > { %v745_v40 = vpop.permute.xlu2 %744 }
  0xf1   : > { %v729_v3 = vpop.permute.xlu1 %728  ;;  %v2336_v17 = vpop.permute.xlu0 %726 }
  0xf9   : > { %v735_v8 = vpop.permute.xlu1 %734  ;;  %v733_v62 = vpop.permute.xlu0 %732 }
  0xfa   : > { %v2345_v32 = vsel %vm865_vm3, %v835_v7, %v733_v62  ;;  %v2348_v54 = vsel %vm865_vm3, %v836_v22, %v735_v8  ;;  %v2373_v22 = vsel %vm865_vm3, %v849_v47, %v761_v10  ;;  %v2397_v62 = vsel %vm865_vm3, %v831_v36, %v725_v20  ;;  %v2954_v47 = vld [vmem:[#allocation10_spill] sm:$0xff] }
  0xfb   : > { %v833_v20 = vsel %vm828_vm2, %v1848_v0, %v2136_v33  ;;  %v715_v0 = vrot.slane %v2117_v31, 2  ;;  %v716_v33 = vrot.slane %v2113_v21, 2 }
  0xfd   : > { %v717_v60 = vsel %vm629_vm1, %v715_v0, %v716_v33 }
 0x101   : > { %v773_v26 = vpop.permute.xlu1 %772  ;;  %v757_v34 = vpop.permute.xlu0 %756 }
 0x102   : > { %v2356_v41 = vsel %vm865_vm3, %v855_v63, %v773_v26  ;;  %v2359_v28 = vsel %vm865_vm3, %v847_v27, %v757_v34  ;;  %v841_v63 = vsel %vm828_vm2, %v1953_v52, %v2250_v15  ;;  %v2415_v27 = vsel %vm865_vm3, %v833_v20, %v729_v3 }
 0x103   : > { %982 = vrot.lane.b32.xlu1 %v2356_v41, %s1784_s8  ;;  %966 = vrot.lane.b32.xlu0 %v2359_v28, %s1784_s8  ;;  %v2421_v26 = vsel %vm865_vm3, %v841_v63, %v745_v40  ;;  %v848_v15 = vsel %vm828_vm2, %v2003_v23, %v2281_v50  ;;  %v856_v3 = vsel %vm828_vm2, %v1986_v11, %v2306_v45  ;;  %v763_v23 = vpop.permute.xlu2 %762  ;;  %v2953_v11 = vld [vmem:[#allocation12_spill] sm:$0xff]  ;;  %v2959_v40 = vld [vmem:[#allocation17_spill] sm:$0xff] }
 0x104   : > { %v858_v45 = vsel %vm828_vm2, %v2953_v11, %v2275_v57 }
 0x109   : > { %v777_v14 = vpop.permute.xlu0 %776  ;;  %v741_v42 = vpop.permute.xlu1 %740 }
 0x10a   : > { %v2376_v7 = vsel %vm865_vm3, %v857_v29, %v777_v14  ;;  %v2394_v8 = vsel %vm865_vm3, %v839_v16, %v741_v42  ;;  %v850_v29 = vsel %vm828_vm2, %v2954_v47, %v2296_v1  ;;  %v2955_v14 = vld [vmem:[#allocation19_spill] sm:$0xff] }
 0x10b   : > { %1064 = vrot.lane.b32.xlu1 %v2373_v22, %s1785_s9  ;;  %786 = vrot.lane.b32.xlu0 %v714_v30, %s1783_s7  ;;  %v832_v42 = vsel %vm828_vm2, %v2956_v19, %v2955_v14  ;;  %v2455_v36 = vsel %vm865_vm3, %v850_v29, %v763_v23  ;;  %v747_v57 = vpop.permute.xlu2 %746  ;;  %v851_v23 = vsel %vm828_vm2, %v2030_v46, %v2294_v37  ;;  %v2963_v37 = vld [vmem:[#allocation18_spill] sm:$0xff] }
 0x10c   : > { %1080 = vrot.lane.b32.xlu2 %v2376_v7, %s1785_s9  ;;  %v2462_v51 = vsel %vm865_vm3, %v832_v42, %v2336_v17  ;;  %v840_v17 = vsel %vm828_vm2, %v2960_v13, %v2959_v40  ;;  %v843_v46 = vsel %vm828_vm2, %v1941_v48, %v2963_v37  ;;  %v1197_v48 = vld [vmem:[%s2909_s3 + $0x18] sm:$0xff]  ;;  %v1196_v29 = vld [vmem:[%s2909_s3 + $0x10] sm:$0xff]  ;;  %v852_v14 = vsel %vm828_vm2, %v2024_v44, %v2242_v35  ;;  %v1195_v44 = vld [vmem:[%s2909_s3 + $0x8] sm:$0xff] }
 0x10d   : > { %v1194_v35 = vld [vmem:[%s2909_s3] sm:$0xff] }
 0x111   : > { %v759_v34 = vpop.permute.xlu0 %758  ;;  %v775_v52 = vpop.permute.xlu1 %774 }
 0x112   : > { %v2435_v10 = vsel %vm865_vm3, %v856_v3, %v775_v52  ;;  %v2438_v30 = vsel %vm865_vm3, %v848_v15, %v759_v34 }
 0x113   : > { %950 = vrot.lane.b32.xlu1 %v2394_v8, %s1784_s8  ;;  %934 = vrot.lane.b32.xlu0 %v2397_v62, %s1784_s8 }
 0x114   : > { %738 = vrot.lane.b32.xlu2 %v654_v43, %s1783_s7  ;;  %v2957_v43 = vld [vmem:[#allocation16_spill] sm:$0xff] }
 0x115   : > { %v834_v39 = vsel %vm828_vm2, %v2958_v2, %v2957_v43 }
 0x116   : > { %v2484_v34 = vsel %vm865_vm3, %v834_v39, %v2308_v6 }
 0x119   : > { %v779_v50 = vpop.permute.xlu0 %778  ;;  %v743_v1 = vpop.permute.xlu1 %742 }
 0x11a   : > { %v2458_v16 = vsel %vm865_vm3, %v858_v45, %v779_v50  ;;  %v2480_v63 = vsel %vm865_vm3, %v840_v17, %v743_v1  ;;  %v859_v50 = vsel %vm828_vm2, %v2100_v58, %v2312_v4  ;;  %v1198_v45 = vld [vmem:[%s2909_s3 + $0x20] sm:$0xf]  ;;  %v853_v17 = vsel %vm828_vm2, %v2055_v9, %v2304_v5 }
 0x11b   : > { %1032 = vrot.lane.b32.xlu1 %v2415_v27, %s1785_s9  ;;  %754 = vrot.lane.b32.xlu0 %v674_v18, %s1783_s7  ;;  %v2961_v18 = vld [vmem:[#allocation7_spill] sm:$0xff] }
 0x11c   : > { %1048 = vrot.lane.b32.xlu2 %v2421_v26, %s1785_s9  ;;  %v842_v20 = vsel %vm828_vm2, %v2961_v18, %v2248_v12  ;;  %v2962_v12 = vld [vmem:[#allocation15_spill] sm:$0xff]  ;;  %1713 = vmatpush.msk.msra.mxu3 %vm1300_vm4, %v1198_v45 }
 0x11d   : > { %v2487_v0 = vsel %vm865_vm3, %v842_v20, %v747_v57  ;;  %v718_v52 = vrot.slane %v2962_v12, 2  ;;  %1712 = vmatpush.msk.msra.mxu2 %vm1300_vm4, %v1198_v45  ;;  %1711 = vmatpush.msk.msra.mxu1 %vm1300_vm4, %v1198_v45  ;;  %v860_v57 = vsel %vm828_vm2, %v2094_v56, %v2310_v55  ;;  %v844_v55 = vsel %vm828_vm2, %v1944_v49, %v2265_v38  ;;  %v2964_v49 = vld [vmem:[#allocation23_spill] sm:$0xff]  ;;  %v2965_v38 = vld [vmem:[#allocation13_spill] sm:$0xff] }
 0x11e   : > { %1673 = vmatpush.msk.msra.mxu0 %vm1300_vm4, %v1198_v45  ;;  %1716 = vmatpush.msra.mxu3 %v1197_v48  ;;  %v861_v18 = vsel %vm828_vm2, %v2965_v38, %v2964_v49 }
 0x11f   : > { %v719_v15 = vsel %vm629_vm1, %v716_v33, %v718_v52  ;;  %1715 = vmatpush.msra.mxu2 %v1197_v48  ;;  %1714 = vmatpush.msra.mxu1 %v1197_v48 }
 0x120   : > { %1316 = vmatpush.msra.mxu0 %v1197_v48  ;;  %1719 = vmatpush.msra.mxu3 %v1196_v29 }
 0x121   : > { %v781_v6 = vpop.permute.xlu1 %780  ;;  %v765_v3 = vpop.permute.xlu0 %764  ;;  %1718 = vmatpush.msra.mxu2 %v1196_v29  ;;  %1717 = vmatpush.msra.mxu1 %v1196_v29 }
 0x122   : > { %v2509_v33 = vsel %vm865_vm3, %v859_v50, %v781_v6  ;;  %v2512_v11 = vsel %vm865_vm3, %v851_v23, %v765_v3  ;;  %1722 = vmatpush.msra.mxu3 %v1195_v44  ;;  %1317 = vmatpush.msra.mxu0 %v1196_v29  ;;  %v2967_v23 = vld [vmem:[#allocation9_spill] sm:$0xff] }
 0x123   : > { %984 = vrot.lane.b32.xlu1 %v2435_v10, %s1784_s8  ;;  %968 = vrot.lane.b32.xlu0 %v2438_v30, %s1784_s8  ;;  %v2968_v29 = vld [vmem:[#allocation25_spill] sm:$0xff] }
 0x124   : > { %788 = vrot.lane.b32.xlu2 %v717_v60, %s1783_s7  ;;  %v749_v60 = vpop.permute.xlu2 %748  ;;  %1721 = vmatpush.msra.mxu2 %v1195_v44 }
 0x125   : > { %v2524_v58 = vsel %vm865_vm3, %v843_v46, %v749_v60  ;;  %1720 = vmatpush.msra.mxu1 %v1195_v44  ;;  %1725 = vmatpush.msra.mxu3 %v1194_v35  ;;  %v2966_v60 = vld [vmem:[#allocation22_spill] sm:$0xff] }
 0x126   : > { %1318 = vmatpush.msra.mxu0 %v1195_v44  ;;  %1724 = vmatpush.msra.mxu2 %v1194_v35  ;;  %v845_v50 = vsel %vm828_vm2, %v2967_v23, %v2966_v60  ;;  %v2970_v44 = vld [vmem:[#allocation27_spill] sm:$0xff] }
 0x127   : > { %1723 = vmatpush.msra.mxu1 %v1194_v35 }
 0x128   : > { %1319 = vmatpush.msra.mxu0 %v1194_v35  ;;  %v2971_v35 = vld [vmem:[#allocation14_spill] sm:$0xff] }
 0x129   : > { %v767_v47 = vpop.permute.xlu0 %766  ;;  %v783_v1 = vpop.permute.xlu1 %782 }
 0x12a   : > { %v2549_v19 = vsel %vm865_vm3, %v852_v14, %v767_v47  ;;  %v2563_v43 = vsel %vm865_vm3, %v860_v57, %v783_v1  ;;  %v2969_v14 = vld [vmem:[#allocation11_spill] sm:$0xff]  ;;  %v862_v1 = vsel %vm828_vm2, %v2971_v35, %v2970_v44 }
 0x12b   : > { %1066 = vrot.lane.b32.xlu0 %v2455_v36, %s1785_s9  ;;  %1082 = vrot.lane.b32.xlu1 %v2458_v16, %s1785_s9 }
 0x12c   : > { %936 = vrot.lane.b32.xlu2 %v2462_v51, %s1784_s8  ;;  %v751_v4 = vpop.permute.xlu2 %750 }
 0x12d   : > { %v2575_v56 = vsel %vm865_vm3, %v844_v55, %v751_v4 }
 0x131   : > { %v769_v40 = vpop.permute.xlu0 %768  ;;  %v785_v13 = vpop.permute.xlu1 %784 }
 0x132   : > { %v890_v20 = vsel %vm865_vm3, %v853_v17, %v769_v40  ;;  %v898_v12 = vsel %vm865_vm3, %v861_v18, %v785_v13 }
 0x133   : > { %952 = vrot.lane.b32.xlu0 %v2480_v63, %s1784_s8  ;;  %1034 = vrot.lane.b32.xlu1 %v2484_v34, %s1785_s9 }
 0x134   : > { %1050 = vrot.lane.b32.xlu2 %v2487_v0, %s1785_s9  ;;  %v753_v42 = vpop.permute.xlu2 %752 }
 0x135   : > { %v882_v37 = vsel %vm865_vm3, %v845_v50, %v753_v42  ;;  %v854_v42 = vsel %vm828_vm2, %v2969_v14, %v2968_v29 }
 0x13b   : > { %970 = vrot.lane.b32.xlu0 %v2373_v22, %s1784_s8  ;;  %986 = vrot.lane.b32.xlu1 %v2376_v7, %s1784_s8 }
 0x13c   : > { %790 = vrot.lane.b32.xlu2 %v719_v15, %s1783_s7  ;;  %v771_v2 = vpop.permute.xlu2 %770 }
 0x13d   : > { %v891_v57 = vsel %vm865_vm3, %v854_v42, %v771_v2  ;;  %v2972_v2 = vld [vmem:[#allocation21_spill] sm:$0xff] }
 0x13e   : > { %v838_v38 = vsel %vm828_vm2, %v1896_v25, %v2972_v2 }
 0x143   : > { %1084 = vrot.lane.b32.xlu1 %v2509_v33, %s1785_s9  ;;  %1068 = vrot.lane.b32.xlu0 %v2512_v11, %s1785_s9 }
 0x144   : > { %938 = vrot.lane.b32.xlu2 %v2415_v27, %s1784_s8 }
 0x14b   : > { %1036 = vrot.lane.b32.xlu1 %v2345_v32, %s1785_s9  ;;  %954 = vrot.lane.b32.xlu0 %v2421_v26, %s1784_s8 }
 0x14c   : > { %1052 = vrot.lane.b32.xlu2 %v2524_v58, %s1785_s9 }
 0x153   : > { %988 = vrot.lane.b32.xlu1 %v2458_v16, %s1784_s8  ;;  %972 = vrot.lane.b32.xlu0 %v2455_v36, %s1784_s8 }
 0x154   : > { %1070 = vrot.lane.b32.xlu2 %v2549_v19, %s1785_s9 }
 0x15b   : > { %940 = vrot.lane.b32.xlu1 %v2484_v34, %s1784_s8  ;;  %1086 = vrot.lane.b32.xlu0 %v2563_v43, %s1785_s9 }
 0x15c   : > { %956 = vrot.lane.b32.xlu2 %v2487_v0, %s1784_s8 }
 0x163   : > { %1054 = vrot.lane.b32.xlu1 %v2575_v56, %s1785_s9  ;;  %1038 = vrot.lane.b32.xlu0 %v2348_v54, %s1785_s9 }
 0x164   : > { %974 = vrot.lane.b32.xlu2 %v2512_v11, %s1784_s8 }
 0x166   : > { %v1081_v39 = vpop.permute.xlu2 %1080 }
 0x16b   : > { %990 = vrot.lane.b32.xlu0 %v2509_v33, %s1784_s8  ;;  %1072 = vrot.lane.b32.xlu1 %v890_v20, %s1785_s9 }
 0x16c   : > { %1088 = vrot.lane.b32.xlu2 %v898_v12, %s1785_s9 }
 0x16e   : > { %v739_v52 = vpop.permute.xlu2 %738 }
 0x16f   : > { %v875_v18 = vsel %vm865_vm3, %v838_v38, %v739_v52 }
 0x173   : > { %942 = vrot.lane.b32.xlu0 %v2345_v32, %s1784_s8  ;;  %958 = vrot.lane.b32.xlu1 %v2524_v58, %s1784_s8 }
 0x174   : > { %1040 = vrot.lane.b32.xlu2 %v2322_v53, %s1785_s9 }
 0x175   : > { %v983_v9 = vpop.permute.xlu1 %982  ;;  %v967_v5 = vpop.permute.xlu0 %966 }
 0x176   : > { %v1153_v15 = vsel %vm1128_vm5, %v890_v20, %v983_v9  ;;  %v1049_v6 = vpop.permute.xlu2 %1048  ;;  %v1145_v46 = vsel %vm1128_vm5, %v882_v37, %v967_v5  ;;  %v2973_v9 = vld [vmem:[#allocation20_spill] sm:$0xff] }
 0x177   : > { %v1186_v3 = vsel %vm1161_vm6, %v1153_v15, %v1081_v39  ;;  %v846_v5 = vsel %vm828_vm2, %v1967_v61, %v2973_v9 }
 0x178   : > { %1698 = vmatmul.msk.f32.vlgmr.msra.gmra.mxu3 %vm1203_vm7, %v1186_v3 }
 0x17b   : > { %1056 = vrot.lane.b32.xlu0 %v882_v37, %s1785_s9  ;;  %976 = vrot.lane.b32.xlu1 %v2549_v19, %s1784_s8 }
 0x17c   : > { %992 = vrot.lane.b32.xlu2 %v2563_v43, %s1784_s8 }
 0x17d   : > { %v1065_v4 = vpop.permute.xlu1 %1064  ;;  %v787_v45 = vpop.permute.xlu0 %786 }
 0x17e   : > { %v789_v48 = vpop.permute.xlu2 %788  ;;  %v1178_v47 = vsel %vm1161_vm6, %v1145_v46, %v1065_v4  ;;  %v899_v55 = vsel %vm865_vm3, %v862_v1, %v787_v45 }
 0x17f   : > { %1690 = vmatmul.msk.f32.vlgmr.msra.gmra.mxu2 %vm1203_vm7, %v1178_v47 }
 0x183   : > { %1074 = vrot.lane.b32.xlu0 %v891_v57, %s1785_s9  ;;  %1090 = vrot.lane.b32.xlu1 %v899_v55, %s1785_s9 }
 0x184   : > { %944 = vrot.lane.b32.xlu2 %v2348_v54, %s1784_s8 }
 0x185   : > { %v951_v39 = vpop.permute.xlu1 %950  ;;  %v935_v40 = vpop.permute.xlu0 %934 }
 0x186   : > { %v1137_v13 = vsel %vm1128_vm5, %v2322_v53, %v951_v39  ;;  %v937_v17 = vpop.permute.xlu2 %936  ;;  %v1129_v15 = vsel %vm1128_vm5, %v2334_v59, %v935_v40  ;;  %v2974_v59 = vld [vmem:[#allocation26_spill] sm:$0xff] }
 0x187   : > { %v1170_v49 = vsel %vm1161_vm6, %v1137_v13, %v1049_v6  ;;  %v863_v46 = vsel %vm828_vm2, %v2117_v31, %v2974_v59  ;;  %v1130_v31 = vsel %vm1128_vm5, %v2331_v24, %v937_v17  ;;  %v2975_v24 = vld [vmem:[#allocation24_spill] sm:$0xff] }
 0x188   : > { %1682 = vmatmul.msk.f32.vlgmr.msra.gmra.mxu1 %vm1203_vm7, %v1170_v49  ;;  %v900_v4 = vsel %vm865_vm3, %v863_v46, %v789_v48  ;;  %v864_v39 = vsel %vm828_vm2, %v2113_v21, %v2975_v24 }
 0x18b   : > { %960 = vrot.lane.b32.xlu0 %v2575_v56, %s1784_s8  ;;  %1042 = vrot.lane.b32.xlu1 %v875_v18, %s1785_s9 }
 0x18d   : > { %v1033_v6 = vpop.permute.xlu1 %1032  ;;  %v755_v3 = vpop.permute.xlu0 %754 }
 0x18e   : > { %v1051_v60 = vpop.permute.xlu2 %1050  ;;  %v1162_v23 = vsel %vm1161_vm6, %v1129_v15, %v1033_v6  ;;  %v883_v25 = vsel %vm865_vm3, %v846_v5, %v755_v3 }
 0x18f   : > { %1674 = vmatmul.msk.f32.vlgmr.msra.gmra.mxu0 %vm1203_vm7, %v1162_v23  ;;  %1058 = vrot.lane.b32.xlu2 %v883_v25, %s1785_s9 }
 0x193   : > { %978 = vrot.lane.b32.xlu0 %v890_v20, %s1784_s8  ;;  %994 = vrot.lane.b32.xlu1 %v898_v12, %s1784_s8 }
 0x195   : > { %v985_v52 = vpop.permute.xlu1 %984  ;;  %v969_v61 = vpop.permute.xlu0 %968 }
 0x196   : > { %v791_v50 = vpop.permute.xlu2 %790  ;;  %v1154_v20 = vsel %vm1128_vm5, %v891_v57, %v985_v52  ;;  %v1146_v12 = vsel %vm1128_vm5, %v883_v25, %v969_v61 }
 0x197   : > { %1076 = vrot.lane.b32.xlu2 %v2356_v41, %s1785_s9  ;;  %v901_v17 = vsel %vm865_vm3, %v864_v39, %v791_v50 }
 0x19b   : > { %1092 = vrot.lane.b32.xlu0 %v900_v4, %s1785_s9  ;;  %946 = vrot.lane.b32.xlu1 %v2322_v53, %s1784_s8 }
 0x19d   : > { %v1083_v45 = vpop.permute.xlu1 %1082  ;;  %v1067_v47 = vpop.permute.xlu0 %1066 }
 0x19e   : > { %v939_v29 = vpop.permute.xlu2 %938  ;;  %v1187_v14 = vsel %vm1161_vm6, %v1154_v20, %v1083_v45  ;;  %v1179_v42 = vsel %vm1161_vm6, %v1146_v12, %v1067_v47 }
 0x19f   : > { %1699 = vmatmul.msk.f32.gmra.mxu3 %vm1203_vm7, %v1187_v14  ;;  %962 = vrot.lane.b32.xlu2 %v882_v37, %s1784_s8 }
 0x1a0   : > { %1691 = vmatmul.msk.f32.gmra.mxu2 %vm1203_vm7, %v1179_v42 }
 0x1a3   : > { %1044 = vrot.lane.b32.xlu0 %v2394_v8, %s1785_s9  ;;  %1060 = vrot.lane.b32.xlu1 %v2359_v28, %s1785_s9 }
 0x1a5   : > { %v1035_v53 = vpop.permute.xlu1 %1034  ;;  %v953_v48 = vpop.permute.xlu0 %952 }
 0x1a6   : > { %v1053_v44 = vpop.permute.xlu2 %1052  ;;  %v1138_v35 = vsel %vm1128_vm5, %v875_v18, %v953_v48  ;;  %v1163_v1 = vsel %vm1161_vm6, %v1130_v31, %v1035_v53 }
 0x1a7   : > { %1675 = vmatmul.msk.f32.gmra.mxu0 %vm1203_vm7, %v1163_v1  ;;  %980 = vrot.lane.b32.xlu2 %v891_v57, %s1784_s8  ;;  %v1171_v37 = vsel %vm1161_vm6, %v1138_v35, %v1051_v60 }
 0x1a8   : > { %1683 = vmatmul.msk.f32.gmra.mxu1 %vm1203_vm7, %v1171_v37 }
 0x1ab   : > { %996 = vrot.lane.b32.xlu0 %v899_v55, %s1784_s8  ;;  %1078 = vrot.lane.b32.xlu1 %v2435_v10, %s1785_s9 }
 0x1ad   : > { %v987_v40 = vpop.permute.xlu1 %986  ;;  %v971_v13 = vpop.permute.xlu0 %970 }
 0x1ae   : > { %v1071_v57 = vpop.permute.xlu2 %1070  ;;  %v1155_v55 = vsel %vm1128_vm5, %v2356_v41, %v987_v40  ;;  %v1147_v49 = vsel %vm1128_vm5, %v2359_v28, %v971_v13  ;;  %v1131_v41 = vsel %vm1128_vm5, %v2397_v62, %v939_v29 }
 0x1af   : > { %1094 = vrot.lane.b32.xlu2 %v901_v17, %s1785_s9 }
 0x1b3   : > { %948 = vrot.lane.b32.xlu0 %v875_v18, %s1784_s8  ;;  %964 = vrot.lane.b32.xlu1 %v883_v25, %s1784_s8 }
 0x1b5   : > { %v1085_v2 = vpop.permute.xlu1 %1084  ;;  %v1069_v38 = vpop.permute.xlu0 %1068 }
 0x1b6   : > { %v1188_v21 = vsel %vm1161_vm6, %v1155_v55, %v1085_v2  ;;  %v1180_v9 = vsel %vm1161_vm6, %v1147_v49, %v1069_v38  ;;  %v957_v18 = vpop.permute.xlu2 %956  ;;  %v2751_v49 = vld [vmem:[%s2910_s4] ss:$0 sm:$0xff]  ;;  %v2754_v2 = vstv %s1417_s23 }
 0x1b7   : > { %1700 = vmatmul.msk.f32.gmra.mxu3 %vm1203_vm7, %v1188_v21  ;;  %1046 = vrot.lane.b32.xlu2 %v2480_v63, %s1785_s9  ;;  %v1140_v4 = vsel %vm1128_vm5, %v2480_v63, %v957_v18 }
 0x1b8   : > { %1692 = vmatmul.msk.f32.gmra.mxu2 %vm1203_vm7, %v1180_v9 }
 0x1bb   : > { %1062 = vrot.lane.b32.xlu0 %v2438_v30, %s1785_s9 }
 0x1bd   : > { %v1037_v28 = vpop.permute.xlu1 %1036  ;;  %v955_v5 = vpop.permute.xlu0 %954 }
 0x1be   : > { %v1139_v15 = vsel %vm1128_vm5, %v2394_v8, %v955_v5  ;;  %v1164_v6 = vsel %vm1161_vm6, %v1131_v41, %v1037_v28  ;;  %v975_v60 = vpop.permute.xlu2 %974 }
 0x1bf   : > { %1676 = vmatmul.msk.f32.gmra.mxu0 %vm1203_vm7, %v1164_v6  ;;  %v1172_v3 = vsel %vm1161_vm6, %v1139_v15, %v1053_v44  ;;  %v1149_v29 = vsel %vm1128_vm5, %v2373_v22, %v975_v60 }
 0x1c0   : > { %1684 = vmatmul.msk.f32.gmra.mxu1 %vm1203_vm7, %v1172_v3 }
 0x1c5   : > { %v989_v23 = vpop.permute.xlu1 %988  ;;  %v973_v25 = vpop.permute.xlu0 %972 }
 0x1c6   : > { %v1148_v52 = vsel %vm1128_vm5, %v2438_v30, %v973_v25  ;;  %v1156_v8 = vsel %vm1128_vm5, %v2435_v10, %v989_v23  ;;  %v1089_v59 = vpop.permute.xlu2 %1088 }
 0x1c7   : > { %v1181_v62 = vsel %vm1161_vm6, %v1148_v52, %v1071_v57 }
 0x1c8   : > { %1693 = vmatmul.msk.f32.gmra.mxu2 %vm1203_vm7, %v1181_v62 }
 0x1cd   : > { %v941_v61 = vpop.permute.xlu1 %940  ;;  %v1087_v50 = vpop.permute.xlu0 %1086 }
 0x1ce   : > { %v1189_v46 = vsel %vm1161_vm6, %v1156_v8, %v1087_v50  ;;  %v1132_v30 = vsel %vm1128_vm5, %v2462_v51, %v941_v61  ;;  %v1041_v10 = vpop.permute.xlu2 %1040 }
 0x1cf   : > { %1701 = vmatmul.msk.f32.gmra.mxu3 %vm1203_vm7, %v1189_v46 }
 0x1d5   : > { %v1055_v20 = vpop.permute.xlu1 %1054  ;;  %v1039_v12 = vpop.permute.xlu0 %1038 }
 0x1d6   : > { %v1165_v45 = vsel %vm1161_vm6, %v1132_v30, %v1039_v12  ;;  %v1173_v47 = vsel %vm1161_vm6, %v1140_v4, %v1055_v20  ;;  %v993_v53 = vpop.permute.xlu2 %992 }
 0x1d7   : > { %1677 = vmatmul.msk.f32.gmra.mxu0 %vm1203_vm7, %v1165_v45  ;;  %1685 = vmatmul.msk.f32.gmra.mxu1 %vm1203_vm7, %v1173_v47 }
 0x1dd   : > { %v1073_v14 = vpop.permute.xlu1 %1072  ;;  %v991_v42 = vpop.permute.xlu0 %990 }
 0x1de   : > { %v1157_v63 = vsel %vm1128_vm5, %v2376_v7, %v991_v42  ;;  %v1182_v51 = vsel %vm1161_vm6, %v1149_v29, %v1073_v14  ;;  %v945_v1 = vpop.permute.xlu2 %944 }
 0x1df   : > { %1694 = vmatmul.msk.f32.gmra.mxu2 %vm1203_vm7, %v1182_v51  ;;  %v1190_v31 = vsel %vm1161_vm6, %v1157_v63, %v1089_v59  ;;  %v1134_v38 = vsel %vm1128_vm5, %v2484_v34, %v945_v1 }
 0x1e0   : > { %1702 = vmatmul.msk.f32.gmra.mxu3 %vm1203_vm7, %v1190_v31 }
 0x1e5   : > { %v959_v48 = vpop.permute.xlu1 %958  ;;  %v943_v44 = vpop.permute.xlu0 %942 }
 0x1e6   : > { %v1133_v35 = vsel %vm1128_vm5, %v2415_v27, %v943_v44  ;;  %v1141_v7 = vsel %vm1128_vm5, %v2421_v26, %v959_v48  ;;  %v1158_v27 = vsel %vm1128_vm5, %v2458_v16, %v993_v53 }
 0x1e7   : > { %v1166_v22 = vsel %vm1161_vm6, %v1133_v35, %v1041_v10 }
 0x1e8   : > { %1678 = vmatmul.msk.f32.gmra.mxu0 %vm1203_vm7, %v1166_v22 }
 0x1e9   : > { %v1059_v40 = vpop.permute.xlu2 %1058 }
 0x1ed   : > { %v977_v37 = vpop.permute.xlu1 %976  ;;  %v1057_v24 = vpop.permute.xlu0 %1056 }
 0x1ee   : > { %v1174_v39 = vsel %vm1161_vm6, %v1141_v7, %v1057_v24  ;;  %v1150_v13 = vsel %vm1128_vm5, %v2455_v36, %v977_v37 }
 0x1ef   : > { %1686 = vmatmul.msk.f32.gmra.mxu1 %vm1203_vm7, %v1174_v39 }
 0x1f1   : > { %v1077_v5 = vpop.permute.xlu2 %1076 }
 0x1f5   : > { %v1091_v17 = vpop.permute.xlu1 %1090  ;;  %v1075_v57 = vpop.permute.xlu0 %1074 }
 0x1f6   : > { %v1183_v55 = vsel %vm1161_vm6, %v1150_v13, %v1075_v57  ;;  %v1191_v26 = vsel %vm1161_vm6, %v1158_v27, %v1091_v17 }
 0x1f7   : > { %1695 = vmatmul.msk.f32.gmra.mxu2 %vm1203_vm7, %v1183_v55  ;;  %1703 = vmatmul.msk.f32.gmra.mxu3 %vm1203_vm7, %v1191_v26 }
 0x1f9   : > { %v963_v59 = vpop.permute.xlu2 %962 }
 0x1fa   : > { %v1143_v14 = vsel %vm1128_vm5, %v2524_v58, %v963_v59 }
 0x1fb   : > { %v1393_v16 = vpop.f32.mrf.mxu3 }
 0x1fc   : > { %v1394_v36 = vadd.f32 %v2751_v49, %v1393_v16 }
 0x1fd   : > { %v1043_v21 = vpop.permute.xlu1 %1042  ;;  %v961_v9 = vpop.permute.xlu0 %960 }
 0x1fe   : > { %vm1442_vm8 = vcmp.ge.f32.partialorder %v1394_v36, 0.0  ;;  %v1475_v18 = vmul.f32 %v2754_v2, %v1394_v36  ;;  %v1142_v41 = vsel %vm1128_vm5, %v2487_v0, %v961_v9  ;;  %v1167_v28 = vsel %vm1161_vm6, %v1134_v38, %v1043_v21 }
 0x1ff   : > { %1679 = vmatmul.msk.f32.gmra.mxu0 %vm1203_vm7, %v1167_v28  ;;  %v1175_v34 = vsel %vm1161_vm6, %v1142_v41, %v1059_v40 }
 0x200   : > { %v1507_v15 = vsel %vm1442_vm8, %v1394_v36, %v1475_v18  ;;  %1687 = vmatmul.msk.f32.gmra.mxu1 %vm1203_vm7, %v1175_v34 }
 0x201   : > { %1539 = vst [vmem:[%s2762_s29 + $0xc0] sm:$0xff] %v1507_v15  ;;  %v981_v29 = vpop.permute.xlu2 %980 }
 0x202   : > { %v1369_v6 = vpop.f32.mrf.mxu2  ;;  %v1152_v53 = vsel %vm1128_vm5, %v2549_v19, %v981_v29 }
 0x203   : > { %v1370_v3 = vadd.f32 %v2751_v49, %v1369_v6 }
 0x205   : > { %vm1434_vm9 = vcmp.ge.f32.partialorder %v1370_v3, 0.0  ;;  %v1467_v60 = vmul.f32 %v2754_v2, %v1370_v3  ;;  %v1345_v0 = vpop.f32.mrf.mxu1  ;;  %v995_v23 = vpop.permute.xlu1 %994 }
 0x206   : > { %v1346_v25 = vadd.f32 %v2751_v49, %v1345_v0  ;;  %v979_v52 = vpop.permute.xlu0 %978  ;;  %v1159_v12 = vsel %vm1128_vm5, %v2509_v33, %v995_v23 }
 0x207   : > { %v1499_v62 = vsel %vm1434_vm9, %v1370_v3, %v1467_v60  ;;  %v1151_v8 = vsel %vm1128_vm5, %v2512_v11, %v979_v52 }
 0x208   : > { %1531 = vst [vmem:[%s2762_s29 + $0x80] sm:$0xff] %v1499_v62  ;;  %vm1426_vm10 = vcmp.ge.f32.partialorder %v1346_v25, 0.0  ;;  %v1459_v61 = vmul.f32 %v2754_v2, %v1346_v25  ;;  %v1184_v50 = vsel %vm1161_vm6, %v1151_v8, %v1077_v5 }
 0x209   : > { %1696 = vmatmul.msk.f32.gmra.mxu2 %vm1203_vm7, %v1184_v50  ;;  %v1095_v48 = vpop.permute.xlu2 %1094 }
 0x20a   : > { %v1491_v46 = vsel %vm1426_vm10, %v1346_v25, %v1459_v61 }
 0x20b   : > { %1523 = vst [vmem:[%s2762_s29 + $0x40] sm:$0xff] %v1491_v46 }
 0x20c   : > { %v1321_v4 = vpop.f32.mrf.mxu0 }
 0x20d   : > { %v1322_v30 = vadd.f32 %v2751_v49, %v1321_v4  ;;  %v947_v20 = vpop.permute.xlu1 %946 }
 0x20e   : > { %v1093_v11 = vpop.permute.xlu0 %1092  ;;  %v1135_v63 = vsel %vm1128_vm5, %v2345_v32, %v947_v20 }
 0x20f   : > { %vm1418_vm11 = vcmp.ge.f32.partialorder %v1322_v30, 0.0  ;;  %v1451_v45 = vmul.f32 %v2754_v2, %v1322_v30  ;;  %v1192_v47 = vsel %vm1161_vm6, %v1159_v12, %v1093_v11 }
 0x210   : > { %1704 = vmatmul.msk.f32.gmra.mxu3 %vm1203_vm7, %v1192_v47 }
 0x211   : > { %v1483_v10 = vsel %vm1418_vm11, %v1322_v30, %v1451_v45  ;;  %v1047_v57 = vpop.permute.xlu2 %1046 }
 0x212   : > { %1515 = vst [vmem:[%s2762_s29] sm:$0xff] %v1483_v10 }
 0x215   : > { %v1061_v42 = vpop.permute.xlu1 %1060 }
 0x216   : > { %v1045_v51 = vpop.permute.xlu0 %1044  ;;  %v1176_v33 = vsel %vm1161_vm6, %v1143_v14, %v1061_v42 }
 0x217   : > { %v1168_v31 = vsel %vm1161_vm6, %v1135_v63, %v1045_v51  ;;  %1688 = vmatmul.msk.f32.gmra.mxu1 %vm1203_vm7, %v1176_v33 }
 0x218   : > { %1680 = vmatmul.msk.f32.gmra.mxu0 %vm1203_vm7, %v1168_v31 }
 0x21d   : > { %v1079_v44 = vpop.permute.xlu1 %1078 }
 0x21e   : > { %v997_v35 = vpop.permute.xlu0 %996  ;;  %v1185_v58 = vsel %vm1161_vm6, %v1152_v53, %v1079_v44 }
 0x21f   : > { %v1160_v32 = vsel %vm1128_vm5, %v2563_v43, %v997_v35  ;;  %1697 = vmatmul.msk.f32.gmra.mxu2 %vm1203_vm7, %v1185_v58 }
 0x220   : > { %v1193_v22 = vsel %vm1161_vm6, %v1160_v32, %v1095_v48 }
 0x221   : > { %1705 = vmatmul.msk.f32.gmra.mxu3 %vm1203_vm7, %v1193_v22 }
 0x222   : > { %v1396_v1 = vpop.f32.mrf.mxu3 }
 0x223   : > { %v1372_v7 = vpop.f32.mrf.mxu2  ;;  %v1397_v37 = vadd.f32 %v2751_v49, %v1396_v1 }
 0x224   : > { %v1373_v19 = vadd.f32 %v2751_v49, %v1372_v7  ;;  %v1324_v24 = vpop.f32.mrf.mxu0 }
 0x225   : > { %vm1443_vm12 = vcmp.ge.f32.partialorder %v1397_v37, 0.0  ;;  %v1476_v39 = vmul.f32 %v2754_v2, %v1397_v37  ;;  %v1325_v40 = vadd.f32 %v2751_v49, %v1324_v24  ;;  %v1348_v43 = vpop.f32.mrf.mxu1  ;;  %v965_v41 = vpop.permute.xlu1 %964 }
 0x226   : > { %vm1435_vm13 = vcmp.ge.f32.partialorder %v1373_v19, 0.0  ;;  %v1468_v27 = vmul.f32 %v2754_v2, %v1373_v19  ;;  %v1349_v13 = vadd.f32 %v2751_v49, %v1348_v43  ;;  %v949_v17 = vpop.permute.xlu0 %948  ;;  %v1144_v28 = vsel %vm1128_vm5, %v2575_v56, %v965_v41 }
 0x227   : > { %v1508_v55 = vsel %vm1443_vm12, %v1397_v37, %v1476_v39  ;;  %vm1419_vm14 = vcmp.ge.f32.partialorder %v1325_v40, 0.0  ;;  %v1452_v26 = vmul.f32 %v2754_v2, %v1325_v40  ;;  %v1136_v16 = vsel %vm1128_vm5, %v2348_v54, %v949_v17 }
 0x228   : > { %v1500_v36 = vsel %vm1435_vm13, %v1373_v19, %v1468_v27  ;;  %1540 = vst [vmem:[%s2762_s29 + $0xc8] sm:$0xff] %v1508_v55  ;;  %vm1427_vm15 = vcmp.ge.f32.partialorder %v1349_v13, 0.0  ;;  %v1460_v38 = vmul.f32 %v2754_v2, %v1349_v13  ;;  %v1169_v21 = vsel %vm1161_vm6, %v1136_v16, %v1047_v57 }
 0x229   : > { %1532 = vst [vmem:[%s2762_s29 + $0x88] sm:$0xff] %v1500_v36  ;;  %v1484_v9 = vsel %vm1419_vm14, %v1325_v40, %v1452_v26  ;;  %1681 = vmatmul.msk.f32.gmra.mxu0 %vm1203_vm7, %v1169_v21 }
 0x22a   : > { %1516 = vst [vmem:[%s2762_s29 + $0x8] sm:$0xff] %v1484_v9  ;;  %v1492_v18 = vsel %vm1427_vm15, %v1349_v13, %v1460_v38 }
 0x22b   : > { %1524 = vst [vmem:[%s2762_s29 + $0x48] sm:$0xff] %v1492_v18 }
 0x22e   : > { %v1063_v5 = vpop.permute.xlu0 %1062 }
 0x22f   : > { %v1177_v54 = vsel %vm1161_vm6, %v1144_v28, %v1063_v5 }
 0x230   : > { %1689 = vmatmul.msk.f32.gmra.mxu1 %vm1203_vm7, %v1177_v54 }
 0x23a   : > { %v1399_v34 = vpop.f32.mrf.mxu3 }
 0x23b   : > { %v1375_v15 = vpop.f32.mrf.mxu2  ;;  %v1400_v6 = vadd.f32 %v2751_v49, %v1399_v34 }
 0x23c   : > { %v1376_v3 = vadd.f32 %v2751_v49, %v1375_v15  ;;  %v1327_v60 = vpop.f32.mrf.mxu0 }
 0x23d   : > { %vm1444_vm0 = vcmp.ge.f32.partialorder %v1400_v6, 0.0  ;;  %v1477_v0 = vmul.f32 %v2754_v2, %v1400_v6  ;;  %v1328_v56 = vadd.f32 %v2751_v49, %v1327_v60  ;;  %v1351_v23 = vpop.f32.mrf.mxu1 }
 0x23e   : > { %vm1436_vm1 = vcmp.ge.f32.partialorder %v1376_v3, 0.0  ;;  %v1469_v25 = vmul.f32 %v2754_v2, %v1376_v3  ;;  %v1352_v52 = vadd.f32 %v2751_v49, %v1351_v23 }
 0x23f   : > { %v1509_v62 = vsel %vm1444_vm0, %v1400_v6, %v1477_v0  ;;  %vm1420_vm2 = vcmp.ge.f32.partialorder %v1328_v56, 0.0  ;;  %v1453_v8 = vmul.f32 %v2754_v2, %v1328_v56 }
 0x240   : > { %v1501_v61 = vsel %vm1436_vm1, %v1376_v3, %v1469_v25  ;;  %1541 = vst [vmem:[%s2762_s29 + $0xd0] sm:$0xff] %v1509_v62  ;;  %vm1428_vm3 = vcmp.ge.f32.partialorder %v1352_v52, 0.0  ;;  %v1461_v50 = vmul.f32 %v2754_v2, %v1352_v52 }
 0x241   : > { %1533 = vst [vmem:[%s2762_s29 + $0x90] sm:$0xff] %v1501_v61  ;;  %v1485_v59 = vsel %vm1420_vm2, %v1328_v56, %v1453_v8 }
 0x242   : > { %1517 = vst [vmem:[%s2762_s29 + $0x10] sm:$0xff] %v1485_v59  ;;  %v1493_v46 = vsel %vm1428_vm3, %v1352_v52, %v1461_v50 }
 0x243   : > { %1525 = vst [vmem:[%s2762_s29 + $0x50] sm:$0xff] %v1493_v46 }
 0x24b   : > { %v1378_v4 = vpop.f32.mrf.mxu2 }
 0x24c   : > { %v1379_v30 = vadd.f32 %v2751_v49, %v1378_v4 }
 0x24e   : > { %vm1437_vm4 = vcmp.ge.f32.partialorder %v1379_v30, 0.0  ;;  %v1470_v20 = vmul.f32 %v2754_v2, %v1379_v30 }
 0x250   : > { %v1502_v12 = vsel %vm1437_vm4, %v1379_v30, %v1470_v20 }
 0x251   : > { %1534 = vst [vmem:[%s2762_s29 + $0x98] sm:$0xff] %v1502_v12 }
 0x252   : > { %v1402_v11 = vpop.f32.mrf.mxu3 }
 0x253   : > { %v1403_v45 = vadd.f32 %v2751_v49, %v1402_v11 }
 0x254   : > { %v1330_v47 = vpop.f32.mrf.mxu0  ;;  %v1354_v10 = vpop.f32.mrf.mxu1 }
 0x255   : > { %vm1445_vm5 = vcmp.ge.f32.partialorder %v1403_v45, 0.0  ;;  %v1478_v29 = vmul.f32 %v2754_v2, %v1403_v45  ;;  %v1331_v14 = vadd.f32 %v2751_v49, %v1330_v47  ;;  %v1355_v42 = vadd.f32 %v2751_v49, %v1354_v10 }
 0x257   : > { %v1510_v63 = vsel %vm1445_vm5, %v1403_v45, %v1478_v29  ;;  %vm1421_vm6 = vcmp.ge.f32.partialorder %v1331_v14, 0.0  ;;  %v1454_v51 = vmul.f32 %v2754_v2, %v1331_v14  ;;  %vm1429_vm7 = vcmp.ge.f32.partialorder %v1355_v42, 0.0 }
 0x258   : > { %1542 = vst [vmem:[%s2762_s29 + $0xd8] sm:$0xff] %v1510_v63  ;;  %v1462_v33 = vmul.f32 %v2754_v2, %v1355_v42 }
 0x259   : > { %v1486_v31 = vsel %vm1421_vm6, %v1331_v14, %v1454_v51 }
 0x25a   : > { %1518 = vst [vmem:[%s2762_s29 + $0x18] sm:$0xff] %v1486_v31  ;;  %v1494_v53 = vsel %vm1429_vm7, %v1355_v42, %v1462_v33 }
 0x25b   : > { %1526 = vst [vmem:[%s2762_s29 + $0x58] sm:$0xff] %v1494_v53 }
 0x262   : > { %v1381_v48 = vpop.f32.mrf.mxu2 }
 0x263   : > { %v1382_v44 = vadd.f32 %v2751_v49, %v1381_v48  ;;  %v1405_v35 = vpop.f32.mrf.mxu3 }
 0x264   : > { %v1406_v58 = vadd.f32 %v2751_v49, %v1405_v35 }
 0x265   : > { %vm1438_vm8 = vcmp.ge.f32.partialorder %v1382_v44, 0.0  ;;  %v1471_v32 = vmul.f32 %v2754_v2, %v1382_v44  ;;  %v1333_v22 = vpop.f32.mrf.mxu0 }
 0x266   : > { %vm1446_vm9 = vcmp.ge.f32.partialorder %v1406_v58, 0.0  ;;  %v1479_v1 = vmul.f32 %v2754_v2, %v1406_v58  ;;  %v1334_v7 = vadd.f32 %v2751_v49, %v1333_v22 }
 0x267   : > { %v1503_v37 = vsel %vm1438_vm8, %v1382_v44, %v1471_v32 }
 0x268   : > { %1535 = vst [vmem:[%s2762_s29 + $0xa0] sm:$0xff] %v1503_v37  ;;  %v1511_v19 = vsel %vm1446_vm9, %v1406_v58, %v1479_v1  ;;  %vm1422_vm10 = vcmp.ge.f32.partialorder %v1334_v7, 0.0  ;;  %v1455_v24 = vmul.f32 %v2754_v2, %v1334_v7 }
 0x269   : > { %1543 = vst [vmem:[%s2762_s29 + $0xe0] sm:$0xff] %v1511_v19 }
 0x26a   : > { %v1487_v39 = vsel %vm1422_vm10, %v1334_v7, %v1455_v24 }
 0x26b   : > { %1519 = vst [vmem:[%s2762_s29 + $0x20] sm:$0xff] %v1487_v39 }
 0x26c   : > { %v1357_v40 = vpop.f32.mrf.mxu1 }
 0x26d   : > { %v1358_v43 = vadd.f32 %v2751_v49, %v1357_v40 }
 0x26f   : > { %vm1430_vm11 = vcmp.ge.f32.partialorder %v1358_v43, 0.0  ;;  %v1463_v27 = vmul.f32 %v2754_v2, %v1358_v43 }
 0x271   : > { %v1495_v13 = vsel %vm1430_vm11, %v1358_v43, %v1463_v27 }
 0x272   : > { %1527 = vst [vmem:[%s2762_s29 + $0x60] sm:$0xff] %v1495_v13 }
 0x27a   : > { %v1384_v17 = vpop.f32.mrf.mxu2  ;;  %v1408_v57 = vpop.f32.mrf.mxu3 }
 0x27b   : > { %v1385_v55 = vadd.f32 %v2751_v49, %v1384_v17  ;;  %v1409_v26 = vadd.f32 %v2751_v49, %v1408_v57 }
 0x27c   : > { %v1336_v16 = vpop.f32.mrf.mxu0 }
 0x27d   : > { %vm1439_vm12 = vcmp.ge.f32.partialorder %v1385_v55, 0.0  ;;  %v1472_v36 = vmul.f32 %v2754_v2, %v1385_v55  ;;  %vm1447_vm13 = vcmp.ge.f32.partialorder %v1409_v26, 0.0  ;;  %v1480_v38 = vmul.f32 %v2754_v2, %v1409_v26  ;;  %v1360_v21 = vpop.f32.mrf.mxu1 }
 0x27e   : > { %v1337_v9 = vadd.f32 %v2751_v49, %v1336_v16  ;;  %v1361_v18 = vadd.f32 %v2751_v49, %v1360_v21 }
 0x27f   : > { %v1504_v41 = vsel %vm1439_vm12, %v1385_v55, %v1472_v36  ;;  %v1512_v28 = vsel %vm1447_vm13, %v1409_v26, %v1480_v38 }
 0x280   : > { %1536 = vst [vmem:[%s2762_s29 + $0xa8] sm:$0xff] %v1504_v41  ;;  %vm1423_vm14 = vcmp.ge.f32.partialorder %v1337_v9, 0.0  ;;  %v1456_v5 = vmul.f32 %v2754_v2, %v1337_v9  ;;  %vm1431_vm15 = vcmp.ge.f32.partialorder %v1361_v18, 0.0  ;;  %v1464_v54 = vmul.f32 %v2754_v2, %v1361_v18 }
 0x281   : > { %1544 = vst [vmem:[%s2762_s29 + $0xe8] sm:$0xff] %v1512_v28 }
 0x282   : > { %v1488_v34 = vsel %vm1423_vm14, %v1337_v9, %v1456_v5  ;;  %v1496_v15 = vsel %vm1431_vm15, %v1361_v18, %v1464_v54 }
 0x283   : > { %1520 = vst [vmem:[%s2762_s29 + $0x28] sm:$0xff] %v1488_v34 }
 0x284   : > { %1528 = vst [vmem:[%s2762_s29 + $0x68] sm:$0xff] %v1496_v15 }
 0x28c   : > { %v1387_v6 = vpop.f32.mrf.mxu2 }
 0x28d   : > { %v1388_v3 = vadd.f32 %v2751_v49, %v1387_v6 }
 0x28f   : > { %vm1440_vm0 = vcmp.ge.f32.partialorder %v1388_v3, 0.0  ;;  %v1473_v60 = vmul.f32 %v2754_v2, %v1388_v3 }
 0x291   : > { %v1505_v0 = vsel %vm1440_vm0, %v1388_v3, %v1473_v60 }
 0x292   : > { %1537 = vst [vmem:[%s2762_s29 + $0xb0] sm:$0xff] %v1505_v0 }
 0x293   : > { %v1411_v56 = vpop.f32.mrf.mxu3 }
 0x294   : > { %v1412_v23 = vadd.f32 %v2751_v49, %v1411_v56  ;;  %v1363_v25 = vpop.f32.mrf.mxu1 }
 0x295   : > { %v1339_v52 = vpop.f32.mrf.mxu0  ;;  %v1364_v62 = vadd.f32 %v2751_v49, %v1363_v25 }
 0x296   : > { %vm1448_vm1 = vcmp.ge.f32.partialorder %v1412_v23, 0.0  ;;  %v1481_v8 = vmul.f32 %v2754_v2, %v1412_v23  ;;  %v1340_v61 = vadd.f32 %v2751_v49, %v1339_v52 }
 0x297   : > { %vm1432_vm2 = vcmp.ge.f32.partialorder %v1364_v62, 0.0  ;;  %v1465_v50 = vmul.f32 %v2754_v2, %v1364_v62 }
 0x298   : > { %v1513_v59 = vsel %vm1448_vm1, %v1412_v23, %v1481_v8  ;;  %vm1424_vm3 = vcmp.ge.f32.partialorder %v1340_v61, 0.0  ;;  %v1457_v46 = vmul.f32 %v2754_v2, %v1340_v61 }
 0x299   : > { %1545 = vst [vmem:[%s2762_s29 + $0xf0] sm:$0xff] %v1513_v59  ;;  %v1497_v4 = vsel %vm1432_vm2, %v1364_v62, %v1465_v50 }
 0x29a   : > { %v1489_v30 = vsel %vm1424_vm3, %v1340_v61, %v1457_v46  ;;  %1529 = vst [vmem:[%s2762_s29 + $0x70] sm:$0xff] %v1497_v4 }
 0x29b   : > { %1521 = vst [vmem:[%s2762_s29 + $0x30] sm:$0xff] %v1489_v30 }
 0x2a2   : > { %v1390_v20 = vpop.f32.mrf.mxu2 }
 0x2a3   : > { %v1391_v12 = vadd.f32 %v2751_v49, %v1390_v20 }
 0x2a4   : > { %v1414_v11 = vpop.f32.mrf.mxu3 }
 0x2a5   : > { %vm1441_vm4 = vcmp.ge.f32.partialorder %v1391_v12, 0.0  ;;  %v1474_v45 = vmul.f32 %v2754_v2, %v1391_v12  ;;  %v1415_v47 = vadd.f32 %v2751_v49, %v1414_v11 }
 0x2a6   : > { %v1342_v10 = vpop.f32.mrf.mxu0 }
 0x2a7   : > { %v1506_v29 = vsel %vm1441_vm4, %v1391_v12, %v1474_v45  ;;  %vm1449_vm5 = vcmp.ge.f32.partialorder %v1415_v47, 0.0  ;;  %v1482_v14 = vmul.f32 %v2754_v2, %v1415_v47  ;;  %v1343_v42 = vadd.f32 %v2751_v49, %v1342_v10 }
 0x2a8   : > { %1538 = vst [vmem:[%s2762_s29 + $0xb8] sm:$0xff] %v1506_v29 }
 0x2a9   : > { %v1514_v63 = vsel %vm1449_vm5, %v1415_v47, %v1482_v14  ;;  %vm1425_vm6 = vcmp.ge.f32.partialorder %v1343_v42, 0.0  ;;  %v1458_v51 = vmul.f32 %v2754_v2, %v1343_v42 }
 0x2aa   : > { %1546 = vst [vmem:[%s2762_s29 + $0xf8] sm:$0xff] %v1514_v63 }
 0x2ab   : > { %v1490_v33 = vsel %vm1425_vm6, %v1343_v42, %v1458_v51 }
 0x2ac   : > { %1522 = vst [vmem:[%s2762_s29 + $0x38] sm:$0xff] %v1490_v33 }
 0x2ad   : > { %v1366_v31 = vpop.f32.mrf.mxu1 }
 0x2ae   : > { %v1367_v53 = vadd.f32 %v2751_v49, %v1366_v31 }
 0x2b0   : > { %vm1433_vm7 = vcmp.ge.f32.partialorder %v1367_v53, 0.0  ;;  %v1466_v48 = vmul.f32 %v2754_v2, %v1367_v53 }
 0x2b2   : > { %v1498_v44 = vsel %vm1433_vm7, %v1367_v53, %v1466_v48 }
 0x2b3   : > { %1530 = vst [vmem:[%s2762_s29 + $0x78] sm:$0xff] %v1498_v44 }
 0x2b4 PF: > { %s16_s22 = sadd.s32 1, %s1780_s22   ;;  %s2976_s20 = smov %s1776_s21 }
 0x2b5   : > { %p13_p5 = scmp.ge.s32.totalorder %s16_s22, 4   ;;  %s2977_s21 = smov %s2979_s0 }
 0x2b7   :  { %15 = sbr.rel (!%p13_p5) target bundleno = 2 (0x2), region = 69 }

</bundles_post_ra>
